<compile_context>
chip_gen: v6e
topology: v6e:2x2x1
jax: 0.10.0
libtpu: 0.0.40
codegen_flags: <defaults>
</compile_context>

<pallas_src>
import functools

import jax
import jax.numpy as jnp
from jax.experimental import pallas as pl
from jax.experimental.pallas import tpu as pltpu

EMB_DIM = 128      # args.embedding_dim (lane-aligned)
LOC_DIM = 2        # args.location_input_dim
NUM_LAYERS = 3     # args.mlp_location_numlayer
NUM_ENT = 16       # num_ent_uid
NUM_REL = 4
HR_ROWS = NUM_ENT * NUM_REL   # combined (h, r) table rows = 64
BATCH = 200        # demo batch (not a tile multiple -> exercises padding path)


def _round_up(x, m):
    return (x + m - 1) // m * m


def _mlp_dims(input_dim, output_dim, num_layers):
    # replicates MLP.__init__ hidden-dim schedule: 2 -> 44 -> 86 -> 128
    step = (input_dim - output_dim) // num_layers
    return [output_dim + i * step for i in reversed(range(num_layers))]


def _device_kind():
    return jax.devices()[0].device_kind.lower()


def _act_dtype():
    # v6e / v7x VALUs are bf16-capable; v5e and older are not -> keep f32 there.
    kind = _device_kind()
    bf16_ok = ("v6" in kind) or ("v7" in kind) or ("7x" in kind)
    return jnp.bfloat16 if bf16_ok else jnp.float32


def _pick_tm(B):
    # TM only streams through the MXU; grow it to amortize ~0.35us/grid-step.
    # On v7x (2 TensorCores) make sure there are >= 2 tiles to shard.
    kind = _device_kind()
    min_tiles = 2 if (("v7" in kind) or ("7x" in kind)) else 1
    need = _round_up(pl.cdiv(B, min_tiles), 128)
    return max(128, min(512, need))


# ---------------------------------------------------------------------------
# kernel
# ---------------------------------------------------------------------------
def mkge_distmult_kernel(hr_ids_ref, loc_ref,                  # batch-tiled
                         hr_tab_ref,                           # (64,128) bf16, resident
                         w1_ref, b1_ref, w2_ref, b2_ref, w3_ref, b3_ref,
                         alpha_ref,                            # (3,) f32, SMEM
                         score_ref,                            # (TM, 1) f32
                         *, act_dtype):
    tm = loc_ref.shape[0]
    n_rows = hr_tab_ref.shape[0]

    # -- single fused (h,r) gather: one-hot (TM,64) @ hr table (64,128) bf16 --
    # one-hot gather of a bf16 table is exact; f32 accumulation on the MXU.
    ids = hr_ids_ref[...]                                            # (TM, 1) i32
    iota = jax.lax.broadcasted_iota(jnp.int32, (tm, n_rows), 1)
    onehot = (ids == iota).astype(hr_tab_ref.dtype)
    hr = jnp.dot(onehot, hr_tab_ref[...],
                 preferred_element_type=jnp.float32)                 # (TM, 128) f32

    def prelu(y, a):          # Dropout(p=0) is identity; 3-op PReLU on the VPU
        return jnp.where(y >= 0, y, a.astype(y.dtype) * y)

    # -- layer 1: true input dim is 2 -> two f32 lane-broadcast FMAs, no MXU --
    loc = loc_ref[...]                                               # (TM, 2) f32
    y1 = (loc[:, 0:1] * w1_ref[0:1, :]
          + loc[:, 1:2] * w1_ref[1:2, :]
          + b1_ref[...])
    x = prelu(y1.astype(act_dtype), alpha_ref[0])

    # -- layers 2 & 3: bf16 MXU matmuls, f32 accumulation, act_dtype PReLU --
    y2 = jnp.dot(x.astype(w2_ref.dtype), w2_ref[...],
                 preferred_element_type=jnp.float32) + b2_ref[...]
    x = prelu(y2.astype(act_dtype), alpha_ref[1])
    y3 = jnp.dot(x.astype(w3_ref.dtype), w3_ref[...],
                 preferred_element_type=jnp.float32) + b3_ref[...]
    emb_t = prelu(y3.astype(act_dtype), alpha_ref[2])

    # -- distmult score: f32 product + f32 XLU row-reduce (keeps precision,
    #    avoids the transposed MXU contraction / vxpose of the full tile) --
    prod = hr * emb_t.astype(jnp.float32)                            # (TM, 128) f32
    score_ref[...] = jnp.sum(prod, axis=-1, keepdims=True)           # (TM, 1) f32


# ---------------------------------------------------------------------------
# wrapper
# ---------------------------------------------------------------------------
def _build_hr_table(params):
    # hr_tab[h*NUM_REL + r] = ent_emb[h] * rel_emb[r]; product in f32, stored
    # bf16 (exact one-hot gather in-kernel). 64x128 -> 16 KiB, VMEM-resident.
    ent = params["ent_emb"].astype(jnp.float32)        # (NUM_ENT, 128)
    rel = params["rel_emb"].astype(jnp.float32)        # (NUM_REL, 128)
    hr = ent[:, None, :] * rel[None, :, :]             # (NUM_ENT, NUM_REL, 128)
    return hr.reshape(HR_ROWS, EMB_DIM).astype(jnp.bfloat16)


def mkge_forward(params, h_ids, r_ids, t_loc, *, tm=None):
    """h_ids, r_ids: (B, 1) int32; t_loc: (B, 2) float32 -> (B,) distmult scores."""
    B = h_ids.shape[0]
    act_dtype = _act_dtype()
    if tm is None:
        tm = _pick_tm(B)
    n_tiles = pl.cdiv(B, tm)
    bp = n_tiles * tm
    pad = bp - B

    # combined (h, r) index stream; padded rows index row 0 of the hr table
    # (harmless: their scores are sliced off via [:B] below).
    hr_ids = (h_ids.reshape(B, 1).astype(jnp.int32) * NUM_REL
              + r_ids.reshape(B, 1).astype(jnp.int32))
    hr_ids = jnp.pad(hr_ids, ((0, pad), (0, 0)))
    loc = jnp.pad(t_loc.astype(jnp.float32), ((0, pad), (0, 0)))
    hr_tab = _build_hr_table(params)

    batch = lambda w: pl.BlockSpec((tm, w), lambda i: (i, 0))        # streamed
    # constant block index -> weights stay resident, no re-DMA across steps
    const = lambda shape: pl.BlockSpec(shape, lambda i: (0, 0))

    # advisory cost estimate (gather matmul + 2 MXU layers + elementwise)
    flops_per_row = (2 * HR_ROWS * EMB_DIM + 2 * 2 * EMB_DIM * EMB_DIM
                     + 16 * EMB_DIM)
    weight_bytes = (hr_tab.size * 2 + params["w1"].size * 4
                    + params["w2"].size * 2 + params["w3"].size * 2
                    + (params["b1"].size + params["b2"].size
                       + params["b3"].size) * 4 + 12)
    cost = pl.CostEstimate(
        flops=int(bp) * flops_per_row,
        transcendentals=0,
        bytes_accessed=int(bp) * (4 + LOC_DIM * 4 + 4) + int(weight_bytes))

    score = pl.pallas_call(
        functools.partial(mkge_distmult_kernel, act_dtype=act_dtype),
        out_shape=jax.ShapeDtypeStruct((bp, 1), jnp.float32),
        grid=(n_tiles,),
        in_specs=[
            batch(1),                                     # combined (h,r) ids
            batch(LOC_DIM),                               # location features
            const(hr_tab.shape),                          # hr product table (bf16)
            const(params["w1"].shape), const(params["b1"].shape),
            const(params["w2"].shape), const(params["b2"].shape),
            const(params["w3"].shape), const(params["b3"].shape),
            pl.BlockSpec(memory_space=pltpu.MemorySpace.SMEM),   # PReLU slopes
        ],
        out_specs=pl.BlockSpec((tm, 1), lambda i: (i, 0)),
        compiler_params=pltpu.CompilerParams(
            dimension_semantics=("parallel",)),
        cost_estimate=cost,
    )(hr_ids, loc, hr_tab,
      params["w1"], params["b1"], params["w2"], params["b2"],
      params["w3"], params["b3"], params["alphas"])
    return score[:B, 0]


# ---------------------------------------------------------------------------
# params + pure-JAX reference
# ---------------------------------------------------------------------------
def init_params(key):
    ks = jax.random.split(key, 2 + NUM_LAYERS)
    hidden = _mlp_dims(LOC_DIM, EMB_DIM, NUM_LAYERS)
    dims = [LOC_DIM] + hidden

    params = {}
    # xavier-uniform embeddings, stored bf16
    be = (6.0 / (NUM_ENT + EMB_DIM)) ** 0.5
    br = (6.0 / (NUM_REL + EMB_DIM)) ** 0.5
    ent = jax.random.uniform(ks[0], (NUM_ENT, EMB_DIM), jnp.float32, -be, be)
    rel = jax.random.uniform(ks[1], (NUM_REL, EMB_DIM), jnp.float32, -br, br)
    params["ent_emb"] = ent.astype(jnp.bfloat16)          # (16, 128)
    params["rel_emb"] = rel.astype(jnp.bfloat16)          # (4, 128)

    # location-MLP params (torch nn.init.uniform_ -> U[0,1)), zero-padded.
    # Padded lanes stay zero through the MLP because the padded bias is 0 and
    # PReLU(0) == 0, so they never leak into the distmult sum.
    for li in range(NUM_LAYERS):
        din, dout = dims[li], dims[li + 1]
        kw, kb, ka = jax.random.split(ks[2 + li], 3)
        w = jax.random.uniform(kw, (din, dout), jnp.float32)
        b = jax.random.uniform(kb, (dout,), jnp.float32)
        rows = _round_up(din, 8) if li == 0 else EMB_DIM
        w_p = jnp.zeros((rows, EMB_DIM), jnp.float32).at[:din, :dout].set(w)
        b_p = jnp.zeros((1, EMB_DIM), jnp.float32).at[0, :dout].set(b)
        # layer-1 weight feeds VPU lane-broadcast FMAs only -> keep f32;
        # layers 2/3 feed the MXU -> bf16 operands.
        params[f"w{li + 1}"] = w_p if li == 0 else w_p.astype(jnp.bfloat16)
        params[f"b{li + 1}"] = b_p                        # f32
        params[f"alpha{li + 1}"] = jax.random.uniform(ka, (), jnp.float32)
    params["alphas"] = jnp.stack(
        [params[f"alpha{i + 1}"] for i in range(NUM_LAYERS)]).astype(jnp.float32)
    return params


def mkge_forward_ref(params, h_ids, r_ids, t_loc):
    # pure-JAX reference of the same math with the same mixed precision
    act_dtype = _act_dtype()
    hr_tab = _build_hr_table(params)
    hr_id = h_ids.reshape(-1) * NUM_REL + r_ids.reshape(-1)
    hr = hr_tab[hr_id].astype(jnp.float32)

    def prelu(y, a):
        return jnp.where(y >= 0, y, a.astype(y.dtype) * y)

    a = params["alphas"]
    w1 = params["w1"]
    t = t_loc.astype(jnp.float32)
    y = t[:, 0:1] * w1[0:1, :] + t[:, 1:2] * w1[1:2, :] + params["b1"]
    x = prelu(y.astype(act_dtype), a[0])
    for li in (2, 3):
        y = jnp.dot(x.astype(jnp.bfloat16), params[f"w{li}"],
                    preferred_element_type=jnp.float32) + params[f"b{li}"]
        x = prelu(y.astype(act_dtype), a[li - 1])
    return jnp.sum(hr * x.astype(jnp.float32), axis=-1)


if __name__ == "__main__":
    key = jax.random.PRNGKey(0)
    kp, kh, kr, kt = jax.random.split(key, 4)

    params = init_params(kp)
    h = jax.random.randint(kh, (BATCH, 1), 0, NUM_ENT, dtype=jnp.int32)
    r = jax.random.randint(kr, (BATCH, 1), 0, NUM_REL, dtype=jnp.int32)
    t = jax.random.uniform(kt, (BATCH, LOC_DIM), jnp.float32, -1.0, 1.0)

    score = jax.block_until_ready(mkge_forward(params, h, r, t))
    ref = jax.block_until_ready(mkge_forward_ref(params, h, r, t))
    assert score.shape == (BATCH,)
    # bf16 operands (hr table, MLP weights/activations) with f32 accumulation /
    # f32 final reduction; small slack vs the mirrored-precision reference.
    assert jnp.allclose(score, ref, rtol=1e-2, atol=1.0), (score, ref)
    print("KERNEL_OK")
</pallas_src>

<mosaic_0001>
module attributes {stable_mosaic.version = 11 : i64} {
  func.func @mkge_distmult_kernel(%arg0: i32, %arg1: memref<256x1xi32, #tpu.memory_space<vmem>>, %arg2: memref<256x2xf32, #tpu.memory_space<vmem>>, %arg3: memref<64x128xbf16, #tpu.memory_space<vmem>>, %arg4: memref<8x128xf32, #tpu.memory_space<vmem>>, %arg5: memref<1x128xf32, #tpu.memory_space<vmem>>, %arg6: memref<128x128xbf16, #tpu.memory_space<vmem>>, %arg7: memref<1x128xf32, #tpu.memory_space<vmem>>, %arg8: memref<128x128xbf16, #tpu.memory_space<vmem>>, %arg9: memref<1x128xf32, #tpu.memory_space<vmem>>, %arg10: memref<3xf32, #tpu.memory_space<smem>>, %arg11: memref<256x1xf32, #tpu.memory_space<vmem>>) attributes {dimension_semantics = [#tpu.dimension_semantics<parallel>], iteration_bounds = array<i64: 1>, scalar_prefetch = 0 : i64, scratch_operands = 0 : i64, tpu.core_type = #tpu.core_type<tc>, window_params = [{transform_indices = @transform_0, window_bounds = array<i64: 256, 1>}, {transform_indices = @transform_1, window_bounds = array<i64: 256, 2>}, {pipeline_mode = #tpu.pipeline_mode<synchronous>, transform_indices = @transform_2, window_bounds = array<i64: 64, 128>}, {pipeline_mode = #tpu.pipeline_mode<synchronous>, transform_indices = @transform_3, window_bounds = array<i64: 8, 128>}, {pipeline_mode = #tpu.pipeline_mode<synchronous>, transform_indices = @transform_4, window_bounds = array<i64: 1, 128>}, {pipeline_mode = #tpu.pipeline_mode<synchronous>, transform_indices = @transform_5, window_bounds = array<i64: 128, 128>}, {pipeline_mode = #tpu.pipeline_mode<synchronous>, transform_indices = @transform_6, window_bounds = array<i64: 1, 128>}, {pipeline_mode = #tpu.pipeline_mode<synchronous>, transform_indices = @transform_7, window_bounds = array<i64: 128, 128>}, {pipeline_mode = #tpu.pipeline_mode<synchronous>, transform_indices = @transform_8, window_bounds = array<i64: 1, 128>}, {transform_indices = @transform_9, window_bounds = array<i64: 3>}, {transform_indices = @transform_10, window_bounds = array<i64: 256, 1>}]} {
    %c0 = arith.constant 0 : index
    %c0_0 = arith.constant 0 : index
    %0 = vector.load %arg1[%c0, %c0_0] : memref<256x1xi32, #tpu.memory_space<vmem>>, vector<256x1xi32>
    %1 = tpu.iota {dimensions = array<i32: 1>} : vector<256x64xi32>
    %2 = vector.broadcast %0 : vector<256x1xi32> to vector<256x64xi32>
    %3 = arith.cmpi eq, %2, %1 : vector<256x64xi32>
    %4 = arith.extui %3 : vector<256x64xi1> to vector<256x64xi32>
    %5 = arith.sitofp %4 : vector<256x64xi32> to vector<256x64xf32>
    %6 = arith.truncf %5 : vector<256x64xf32> to vector<256x64xbf16>
    %c0_1 = arith.constant 0 : index
    %c0_2 = arith.constant 0 : index
    %7 = vector.load %arg3[%c0_1, %c0_2] : memref<64x128xbf16, #tpu.memory_space<vmem>>, vector<64x128xbf16>
    %cst = arith.constant dense<0.000000e+00> : vector<256x128xf32>
    %8 = tpu.matmul %6, %7, %cst {dimension_numbers = #tpu.dot_dimension_numbers<[1], [0], [0], [1], [0, 0, 1, 1], [], []>} : vector<256x64xbf16>, vector<64x128xbf16>, vector<256x128xf32> -> vector<256x128xf32>
    %c0_3 = arith.constant 0 : index
    %c0_4 = arith.constant 0 : index
    %9 = vector.load %arg2[%c0_3, %c0_4] : memref<256x2xf32, #tpu.memory_space<vmem>>, vector<256x2xf32>
    %10 = vector.extract_strided_slice %9 {offsets = [0, 0], sizes = [256, 1], strides = [1, 1]} : vector<256x2xf32> to vector<256x1xf32>
    %c0_5 = arith.constant 0 : index
    %c0_6 = arith.constant 0 : index
    %11 = vector.load %arg4[%c0_5, %c0_6] : memref<8x128xf32, #tpu.memory_space<vmem>>, vector<1x128xf32>
    %12 = vector.broadcast %10 : vector<256x1xf32> to vector<256x128xf32>
    %13 = vector.broadcast %11 : vector<1x128xf32> to vector<256x128xf32>
    %14 = arith.mulf %12, %13 : vector<256x128xf32>
    %15 = vector.extract_strided_slice %9 {offsets = [0, 1], sizes = [256, 1], strides = [1, 1]} : vector<256x2xf32> to vector<256x1xf32>
    %c1 = arith.constant 1 : index
    %c0_7 = arith.constant 0 : index
    %16 = vector.load %arg4[%c1, %c0_7] : memref<8x128xf32, #tpu.memory_space<vmem>>, vector<1x128xf32>
    %17 = vector.broadcast %15 : vector<256x1xf32> to vector<256x128xf32>
    %18 = vector.broadcast %16 : vector<1x128xf32> to vector<256x128xf32>
    %19 = arith.mulf %17, %18 : vector<256x128xf32>
    %20 = arith.addf %14, %19 : vector<256x128xf32>
    %c0_8 = arith.constant 0 : index
    %c0_9 = arith.constant 0 : index
    %21 = vector.load %arg5[%c0_8, %c0_9] : memref<1x128xf32, #tpu.memory_space<vmem>>, vector<1x128xf32>
    %22 = vector.broadcast %21 : vector<1x128xf32> to vector<256x128xf32>
    %23 = arith.addf %20, %22 : vector<256x128xf32>
    %c0_10 = arith.constant 0 : index
    %24 = memref.load %arg10[%c0_10] : memref<3xf32, #tpu.memory_space<smem>>
    %cst_11 = arith.constant 0.000000e+00 : f32
    %25 = vector.broadcast %cst_11 : f32 to vector<256x128xf32>
    %26 = arith.cmpf oge, %23, %25 : vector<256x128xf32>
    %27 = vector.broadcast %24 : f32 to vector<256x128xf32>
    %28 = arith.mulf %27, %23 : vector<256x128xf32>
    %29 = arith.select %26, %23, %28 : vector<256x128xi1>, vector<256x128xf32>
    %30 = arith.truncf %29 : vector<256x128xf32> to vector<256x128xbf16>
    %c0_12 = arith.constant 0 : index
    %c0_13 = arith.constant 0 : index
    %31 = vector.load %arg6[%c0_12, %c0_13] : memref<128x128xbf16, #tpu.memory_space<vmem>>, vector<128x128xbf16>
    %cst_14 = arith.constant dense<0.000000e+00> : vector<256x128xf32>
    %32 = tpu.matmul %30, %31, %cst_14 {dimension_numbers = #tpu.dot_dimension_numbers<[1], [0], [0], [1], [0, 0, 1, 1], [], []>} : vector<256x128xbf16>, vector<128x128xbf16>, vector<256x128xf32> -> vector<256x128xf32>
    %c0_15 = arith.constant 0 : index
    %c0_16 = arith.constant 0 : index
    %33 = vector.load %arg7[%c0_15, %c0_16] : memref<1x128xf32, #tpu.memory_space<vmem>>, vector<1x128xf32>
    %34 = vector.broadcast %33 : vector<1x128xf32> to vector<256x128xf32>
    %35 = arith.addf %32, %34 : vector<256x128xf32>
    %c1_17 = arith.constant 1 : index
    %36 = memref.load %arg10[%c1_17] : memref<3xf32, #tpu.memory_space<smem>>
    %cst_18 = arith.constant 0.000000e+00 : f32
    %37 = vector.broadcast %cst_18 : f32 to vector<256x128xf32>
    %38 = arith.cmpf oge, %35, %37 : vector<256x128xf32>
    %39 = vector.broadcast %36 : f32 to vector<256x128xf32>
    %40 = arith.mulf %39, %35 : vector<256x128xf32>
    %41 = arith.select %38, %35, %40 : vector<256x128xi1>, vector<256x128xf32>
    %42 = arith.truncf %41 : vector<256x128xf32> to vector<256x128xbf16>
    %c0_19 = arith.constant 0 : index
    %c0_20 = arith.constant 0 : index
    %43 = vector.load %arg8[%c0_19, %c0_20] : memref<128x128xbf16, #tpu.memory_space<vmem>>, vector<128x128xbf16>
    %cst_21 = arith.constant dense<0.000000e+00> : vector<256x128xf32>
    %44 = tpu.matmul %42, %43, %cst_21 {dimension_numbers = #tpu.dot_dimension_numbers<[1], [0], [0], [1], [0, 0, 1, 1], [], []>} : vector<256x128xbf16>, vector<128x128xbf16>, vector<256x128xf32> -> vector<256x128xf32>
    %c0_22 = arith.constant 0 : index
    %c0_23 = arith.constant 0 : index
    %45 = vector.load %arg9[%c0_22, %c0_23] : memref<1x128xf32, #tpu.memory_space<vmem>>, vector<1x128xf32>
    %46 = vector.broadcast %45 : vector<1x128xf32> to vector<256x128xf32>
    %47 = arith.addf %44, %46 : vector<256x128xf32>
    %c2 = arith.constant 2 : index
    %48 = memref.load %arg10[%c2] : memref<3xf32, #tpu.memory_space<smem>>
    %cst_24 = arith.constant 0.000000e+00 : f32
    %49 = vector.broadcast %cst_24 : f32 to vector<256x128xf32>
    %50 = arith.cmpf oge, %47, %49 : vector<256x128xf32>
    %51 = vector.broadcast %48 : f32 to vector<256x128xf32>
    %52 = arith.mulf %51, %47 : vector<256x128xf32>
    %53 = arith.select %50, %47, %52 : vector<256x128xi1>, vector<256x128xf32>
    %54 = arith.mulf %8, %53 : vector<256x128xf32>
    %cst_25 = arith.constant dense<0.000000e+00> : vector<256xf32>
    %55 = vector.multi_reduction <add>, %54, %cst_25 [1] : vector<256x128xf32> to vector<256xf32>
    %56 = vector.shape_cast %55 : vector<256xf32> to vector<256x1xf32>
    %c0_26 = arith.constant 0 : index
    %c0_27 = arith.constant 0 : index
    %57 = vector.load %arg11[%c0_26, %c0_27] : memref<256x1xf32, #tpu.memory_space<vmem>>, vector<256x1xf32>
    tpu.vector_store %arg11[%c0_26, %c0_27], %56 {strides = array<i32>} : memref<256x1xf32, #tpu.memory_space<vmem>>, vector<256x1xf32>,
    return
  }
  func.func @transform_0(%arg0: i32) -> (i32, i32) {
    %c0_i32 = arith.constant 0 : i32
    %c0_i32_0 = arith.constant 0 : i32
    return %arg0, %c0_i32 : i32, i32
  }
  func.func @transform_1(%arg0: i32) -> (i32, i32) {
    %c0_i32 = arith.constant 0 : i32
    %c0_i32_0 = arith.constant 0 : i32
    return %arg0, %c0_i32 : i32, i32
  }
  func.func @transform_2(%arg0: i32) -> (i32, i32) {
    %c0_i32 = arith.constant 0 : i32
    %c0_i32_0 = arith.constant 0 : i32
    %c0_i32_1 = arith.constant 0 : i32
    return %c0_i32, %c0_i32_0 : i32, i32
  }
  func.func @transform_3(%arg0: i32) -> (i32, i32) {
    %c0_i32 = arith.constant 0 : i32
    %c0_i32_0 = arith.constant 0 : i32
    %c0_i32_1 = arith.constant 0 : i32
    return %c0_i32, %c0_i32_0 : i32, i32
  }
  func.func @transform_4(%arg0: i32) -> (i32, i32) {
    %c0_i32 = arith.constant 0 : i32
    %c0_i32_0 = arith.constant 0 : i32
    %c0_i32_1 = arith.constant 0 : i32
    return %c0_i32, %c0_i32_0 : i32, i32
  }
  func.func @transform_5(%arg0: i32) -> (i32, i32) {
    %c0_i32 = arith.constant 0 : i32
    %c0_i32_0 = arith.constant 0 : i32
    %c0_i32_1 = arith.constant 0 : i32
    return %c0_i32, %c0_i32_0 : i32, i32
  }
  func.func @transform_6(%arg0: i32) -> (i32, i32) {
    %c0_i32 = arith.constant 0 : i32
    %c0_i32_0 = arith.constant 0 : i32
    %c0_i32_1 = arith.constant 0 : i32
    return %c0_i32, %c0_i32_0 : i32, i32
  }
  func.func @transform_7(%arg0: i32) -> (i32, i32) {
    %c0_i32 = arith.constant 0 : i32
    %c0_i32_0 = arith.constant 0 : i32
    %c0_i32_1 = arith.constant 0 : i32
    return %c0_i32, %c0_i32_0 : i32, i32
  }
  func.func @transform_8(%arg0: i32) -> (i32, i32) {
    %c0_i32 = arith.constant 0 : i32
    %c0_i32_0 = arith.constant 0 : i32
    %c0_i32_1 = arith.constant 0 : i32
    return %c0_i32, %c0_i32_0 : i32, i32
  }
  func.func @transform_9(%arg0: i32) -> i32 {
    %c0_i32 = arith.constant 0 : i32
    %c0_i32_0 = arith.constant 0 : i32
    return %c0_i32 : i32
  }
  func.func @transform_10(%arg0: i32) -> (i32, i32) {
    %c0_i32 = arith.constant 0 : i32
    %c0_i32_0 = arith.constant 0 : i32
    return %arg0, %c0_i32 : i32, i32
  }
}

</mosaic_0001>

<bundles_post_ra>
// kernel: tpu_custom_call.1
= control target key start
LH: loop header
LB: loop body
LE: loop exit
PB: predicated region body
PF: predicated region fallthrough
CT: control target
= control target key end

     0   :  { %15 = vsyncpa [#allocation3], 0  ;;  %s3327_s0 = inlined_call_operand.vmem [shape: s32[256,1], index: 0, kind: input, shape index: {}]   ;;  %s3328_s1 = inlined_call_operand.vmem [shape: f32[256,2], index: 1, kind: input, shape index: {}]   ;;  %s3329_s2 = inlined_call_operand.vmem [shape: bf16[64,128], index: 2, kind: input, shape index: {}]   ;;  %s3330_s3 = inlined_call_operand.vmem [shape: f32[8,128], index: 3, kind: input, shape index: {}]   ;;  %s3331_s4 = inlined_call_operand.vmem [shape: f32[1,128], index: 4, kind: input, shape index: {}]   ;;  %s3332_s5 = inlined_call_operand.vmem [shape: bf16[128,128], index: 5, kind: input, shape index: {}]   ;;  %s3333_s6 = inlined_call_operand.vmem [shape: f32[1,128], index: 6, kind: input, shape index: {}]   ;;  %s3334_s7 = inlined_call_operand.vmem [shape: bf16[128,128], index: 7, kind: input, shape index: {}]   ;;  %s3335_s8 = inlined_call_operand.vmem [shape: f32[1,128], index: 8, kind: input, shape index: {}]   ;;  %s3336_s9 = inlined_call_operand.vmem [shape: f32[3], index: 9, kind: input, shape index: {}]   ;;  %s3337_s10 = inlined_call_operand.vmem [shape: f32[256,1], index: 10, kind: output, shape index: {}]  }
   0x1   :  { %s40_s15 = sshll.u32 %s3336_s9, 4  ;;  %s41_s15 = int_to_ptr.vmem [resolvable:$true] %s40_s15 }
   0x2   :  { %s2269_s16 = scalar_lea.vmem %s41_s15, 16  ;;  %p2274_p1 = scmp.lt.s32.totalorder %s41_s15, %s41_s15 }
   0x3   :  { %p2270_p0 = scmp.ne.s32.totalorder %s41_s15, %s2269_s16  ;;  %p2275_p2 = scmp.lt.s32.totalorder %s2269_s16, %s2269_s16 }
   0x5   :  { %p2276_p3 = por %p2275_p2, %p2274_p1 }
   0x7   :  { %p2277_p4 = pnand %p2276_p3, %p2270_p0 }
   0x9   :  { %2280 = shalt.err (!%p2277_p4)
}
   0xa   :  { %s2283_s17 = smov [#allocation2]  }
   0xb   :  { %43 = dma.vmem_to_smem %s41_s15, 16, %s2283_s17, [#allocation3]  }
   0xc   :  { %2281 = dma.done.wait [#allocation3], 16  }
   0xd   :  { %2282 = vsyncadd [#allocation3], 4294967280 }
   0xe   :  { %47 = sfence }
   0xf   :  { %v2348_v0 = vld [vmem:[%s3328_s1] sm:$0xff]  ;;  %v67_v1 = vld [vmem:[%s3327_s0 + $0x90] sm:$0xff]  ;;  %v2284_v2 = vmov 1   ;;  %v2285_v3 = vmov 0   ;;  %v68_v5 = vld [vmem:[%s3327_s0 + $0x98] sm:$0xff]  ;;  %vm323_vm4 = vcmask 523264  }
  0x10   :  { %2214 = vset.pattern.permute.xlu0 %v2284_v2  ;;  %2213 = vset.pattern.permute.xlu1 %v2285_v3  ;;  %v2359_v4 = vld [vmem:[%s3328_s1 + $0x20] sm:$0xff]  ;;  %v70_v7 = vld [vmem:[%s3327_s0 + $0xa8] sm:$0xff]  ;;  %v72_v9 = vld [vmem:[%s3327_s0 + $0xb8] sm:$0xff]  ;;  %s2697_s18 = sld [smem:[#allocation2]] }
  0x11   :  { %764 = vperm.xlu0 %2214, %v2348_v0   ;;  %138 = vperm.xlu1 %2213, %v67_v1   ;;  %v2368_v6 = vld [vmem:[%s3328_s1 + $0x40] sm:$0xff]  ;;  %v74_v11 = vld [vmem:[%s3327_s0 + $0xc8] sm:$0xff]  ;;  %v76_v13 = vld [vmem:[%s3327_s0 + $0xd8] sm:$0xff]  ;;  %s1986_s30 = sld [smem:[#allocation2 + $0x1]] }
  0x12   :  { %v2377_v8 = vld [vmem:[%s3328_s1 + $0x60] sm:$0xff]  ;;  %v78_v15 = vld [vmem:[%s3327_s0 + $0xe8] sm:$0xff]  ;;  %v2249_v16 = vld [vmem:[%s3329_s2 + $0x18] sm:$0xff]  }
  0x13   :  { %v2386_v10 = vld [vmem:[%s3328_s1 + $0x80] sm:$0xff]  ;;  %2201 = vmatprep.subr.bf16.mxu1 %v2249_v16  ;;  %2065 = vmatprep.subr.bf16.mxu0 %v2249_v16  ;;  %v2250_v18 = vld [vmem:[%s3329_s2 + $0x10] sm:$0xff]   ;;  %v80_v19 = vld [vmem:[%s3327_s0 + $0xf8] sm:$0xff] }
  0x14   :  { %v2394_v12 = vld [vmem:[%s3328_s1 + $0xa0] sm:$0xff]  ;;  %2205 = vmatpush3.bf16.msra.mxu1 %v2249_v16  ;;  %2066 = vmatpush3.bf16.msra.mxu0 %v2249_v16  ;;  %v534_v20 = vld [vmem:[%s3328_s1 + $0x8] sm:$0xff]  ;;  %v535_v26 = vld [vmem:[%s3328_s1 + $0x10] sm:$0xff] }
  0x15   :  { %780 = vperm.xlu0 %2214, %v2359_v4   ;;  %141 = vperm.xlu1 %2213, %v68_v5   ;;  %v2403_v14 = vld [vmem:[%s3328_s1 + $0xc0] sm:$0xff]  ;;  %v2251_v21 = vld [vmem:[%s3329_s2 + $0x8] sm:$0xff]   ;;  %v71_v27 = vld [vmem:[%s3327_s0 + $0xb0] sm:$0xff] }
  0x16   :  { %v2416_v17 = vld [vmem:[%s3328_s1 + $0xe0] sm:$0xff]  ;;  %2202 = vmatprep.subr.bf16.mxu1 %v2250_v18  ;;  %2067 = vmatprep.subr.bf16.mxu0 %v2250_v18  ;;  %v66_v24 = vld [vmem:[%s3327_s0 + $0x88] sm:$0xff]  ;;  %v2455_v28 = vld [vmem:[%s3332_s5 + $0x38] sm:$0xff]  }
  0x17   :  { %v65_v22 = vld [vmem:[%s3327_s0 + $0x80] sm:$0xff]  ;;  %v536_v30 = vld [vmem:[%s3328_s1 + $0x18] sm:$0xff]  ;;  %v75_v31 = vld [vmem:[%s3327_s0 + $0xd0] sm:$0xff] }
  0x18   :  { %2206 = vmatpush3.bf16.msra.mxu1 %v2250_v18  ;;  %2068 = vmatpush3.bf16.msra.mxu0 %v2250_v18  ;;  %v2252_v23 = vld [vmem:[%s3329_s2] sm:$0xff]   ;;  %v538_v32 = vld [vmem:[%s3328_s1 + $0x28] sm:$0xff]  ;;  %v79_v34 = vld [vmem:[%s3327_s0 + $0xf0] sm:$0xff] }
  0x19   :  { %796 = vperm.xlu0 %2214, %v2368_v6   ;;  %147 = vperm.xlu1 %2213, %v70_v7   ;;  %v69_v25 = vld [vmem:[%s3327_s0 + $0xa0] sm:$0xff]  ;;  %v539_v35 = vld [vmem:[%s3328_s1 + $0x30] sm:$0xff]  ;;  %v540_v36 = vld [vmem:[%s3328_s1 + $0x38] sm:$0xff] }
  0x1a   :  { %2203 = vmatprep.subr.bf16.mxu1 %v2251_v21  ;;  %2069 = vmatprep.subr.bf16.mxu0 %v2251_v21  ;;  %v73_v29 = vld [vmem:[%s3327_s0 + $0xc0] sm:$0xff]  ;;  %v542_v37 = vld [vmem:[%s3328_s1 + $0x48] sm:$0xff]  ;;  %v544_v38 = vld [vmem:[%s3328_s1 + $0x58] sm:$0xff] }
  0x1b   :  { %v77_v33 = vld [vmem:[%s3327_s0 + $0xe0] sm:$0xff]  ;;  %v543_v39 = vld [vmem:[%s3328_s1 + $0x50] sm:$0xff]  ;;  %v548_v40 = vld [vmem:[%s3328_s1 + $0x78] sm:$0xff] }
  0x1c   :  { %2207 = vmatpush3.bf16.msra.mxu1 %v2251_v21  ;;  %2070 = vmatpush3.bf16.msra.mxu0 %v2251_v21  ;;  %v552_v41 = vld [vmem:[%s3328_s1 + $0x98] sm:$0xff]  ;;  %v546_v42 = vld [vmem:[%s3328_s1 + $0x68] sm:$0xff]  ;;  %v547_v44 = vld [vmem:[%s3328_s1 + $0x70] sm:$0xff] }
  0x1d   :  { %812 = vperm.xlu0 %2214, %v2377_v8   ;;  %153 = vperm.xlu1 %2213, %v72_v9   ;;  %v2519_v43 = vld [vmem:[%s3328_s1 + $0xb8] sm:$0xff]  ;;  %v550_v49 = vld [vmem:[%s3328_s1 + $0x88] sm:$0xff]  ;;  %v49_v50 = vld [vmem:[%s3327_s0] sm:$0xff]  ;;  %v81_v9 = vlaneseq }
  0x1e   :  { %2204 = vmatprep.subr.bf16.mxu1 %v2252_v23  ;;  %2071 = vmatprep.subr.bf16.mxu0 %v2252_v23  ;;  %v2531_v45 = vld [vmem:[%s3328_s1 + $0xd8] sm:$0xff]  ;;  %v51_v53 = vld [vmem:[%s3327_s0 + $0x10] sm:$0xff]  ;;  %v53_v56 = vld [vmem:[%s3327_s0 + $0x20] sm:$0xff] }
  0x1f   :  { %v2539_v46 = vld [vmem:[%s3328_s1 + $0xf8] sm:$0xff]  ;;  %v551_v59 = vld [vmem:[%s3328_s1 + $0x90] sm:$0xff]  ;;  %v57_v63 = vld [vmem:[%s3327_s0 + $0x40] sm:$0xff] }
  0x20   :  { %2208 = vmatpush3.bf16.msra.mxu1 %v2252_v23  ;;  %2072 = vmatpush3.bf16.msra.mxu0 %v2252_v23  ;;  %v55_v60 = vld [vmem:[%s3327_s0 + $0x30] sm:$0xff]  ;;  %v554_v7 = vld [vmem:[%s3328_s1 + $0xa8] sm:$0xff] }
  0x21   :  { %828 = vperm.xlu0 %2214, %v2386_v10   ;;  %159 = vperm.xlu1 %2213, %v74_v11   ;;  %v555_v16 = vld [vmem:[%s3328_s1 + $0xb0] sm:$0xff] }
  0x22   :  { %2105 = vmatprep.subr.bf16.mxu1 %v2455_v28 }
  0x25   :  { %844 = vperm.xlu0 %2214, %v2394_v12   ;;  %165 = vperm.xlu1 %2213, %v76_v13   ;;  %v2610_v13 = vand.u32 127, %v81_v9 }
  0x29   :  { %860 = vperm.xlu0 %2214, %v2403_v14   ;;  %171 = vperm.xlu1 %2213, %v78_v15  }
  0x2d   :  { %876 = vperm.xlu0 %2214, %v2416_v17   ;;  %177 = vperm.xlu1 %2213, %v80_v19  }
  0x31   :  { %2243 = vset.pattern.permute.xlu0 %v2285_v3  ;;  %573 = vperm.xlu1 %2213, %v534_v20  }
  0x32   :  { %132 = vperm.xlu0 %2243, %v65_v22  }
  0x35   :  { %2215 = vset.pattern.permute.xlu1 %v2284_v2 }
  0x36   :  { %768 = vperm.xlu1 %2215, %v534_v20   ;;  %135 = vperm.xlu0 %2243, %v66_v24  }
  0x3a   :  { %2216 = vset.pattern.permute.xlu1 %v2285_v3  ;;  %144 = vperm.xlu0 %2243, %v69_v25  }
  0x3b   :  { %578 = vperm.xlu1 %2216, %v535_v26  }
  0x3e   :  { %150 = vperm.xlu0 %2243, %v71_v27   ;;  %v2254_v27 = vld [vmem:[%s3332_s5 + $0x30] sm:$0xff]  }
  0x3f   :  { %2217 = vset.pattern.permute.xlu1 %v2284_v2 }
  0x40   :  { %772 = vperm.xlu1 %2217, %v535_v26  }
  0x42   :  { %156 = vperm.xlu0 %2243, %v73_v29  }
  0x44   :  { %776 = vperm.xlu1 %2217, %v536_v30  }
  0x46   :  { %162 = vperm.xlu0 %2243, %v75_v31  }
  0x48   :  { %2218 = vset.pattern.permute.xlu1 %v2285_v3 }
  0x49   :  { %593 = vperm.xlu1 %2218, %v538_v32  }
  0x4a   :  { %168 = vperm.xlu0 %2243, %v77_v33  }
  0x4d   :  { %2219 = vset.pattern.permute.xlu1 %v2284_v2 }
  0x4e   :  { %784 = vperm.xlu1 %2219, %v538_v32   ;;  %174 = vperm.xlu0 %2243, %v79_v34   ;;  %v2255_v34 = vld [vmem:[%s3332_s5 + $0x28] sm:$0xff]  }
  0x52   :  { %2220 = vset.pattern.permute.xlu1 %v2285_v3  ;;  %568 = vperm.xlu0 %2243, %v2348_v0  }
  0x53   :  { %598 = vperm.xlu1 %2220, %v539_v35  }
  0x56   :  { %583 = vperm.xlu0 %2243, %v536_v30  }
  0x57   :  { %2221 = vset.pattern.permute.xlu1 %v2284_v2 }
  0x58   :  { %788 = vperm.xlu1 %2221, %v539_v35  }
  0x5a   :  { %588 = vperm.xlu0 %2243, %v2359_v4   ;;  %v59_v4 = vld [vmem:[%s3327_s0 + $0x50] sm:$0xff] }
  0x5c   :  { %792 = vperm.xlu1 %2221, %v540_v36  }
  0x5e   :  { %603 = vperm.xlu0 %2243, %v540_v36  }
  0x60   :  { %2222 = vset.pattern.permute.xlu1 %v2285_v3 }
  0x61   :  { %613 = vperm.xlu1 %2222, %v542_v37  }
  0x62   :  { %608 = vperm.xlu0 %2243, %v2368_v6  }
  0x65   :  { %2223 = vset.pattern.permute.xlu1 %v2284_v2 }
  0x66   :  { %800 = vperm.xlu1 %2223, %v542_v37   ;;  %623 = vperm.xlu0 %2243, %v544_v38  }
  0x6a   :  { %2224 = vset.pattern.permute.xlu1 %v2285_v3  ;;  %628 = vperm.xlu0 %2243, %v2377_v8   ;;  %v61_v8 = vld [vmem:[%s3327_s0 + $0x60] sm:$0xff] }
  0x6b   :  { %618 = vperm.xlu1 %2224, %v543_v39  }
  0x6e   :  { %643 = vperm.xlu0 %2243, %v548_v40  }
  0x6f   :  { %2225 = vset.pattern.permute.xlu1 %v2284_v2 }
  0x70   :  { %804 = vperm.xlu1 %2225, %v543_v39   ;;  %v2256_v39 = vld [vmem:[%s3332_s5 + $0x20] sm:$0xff]  }
  0x72   :  { %648 = vperm.xlu0 %2243, %v2386_v10  }
  0x74   :  { %808 = vperm.xlu1 %2225, %v544_v38  }
  0x76   :  { %663 = vperm.xlu0 %2243, %v552_v41  }
  0x78   :  { %2226 = vset.pattern.permute.xlu1 %v2285_v3 }
  0x79   :  { %633 = vperm.xlu1 %2226, %v546_v42  }
  0x7a   :  { %668 = vperm.xlu0 %2243, %v2394_v12   ;;  %v63_v12 = vld [vmem:[%s3327_s0 + $0x70] sm:$0xff] }
  0x7d   :  { %2227 = vset.pattern.permute.xlu1 %v2284_v2 }
  0x7e   :  { %816 = vperm.xlu1 %2227, %v546_v42   ;;  %683 = vperm.xlu0 %2243, %v2519_v43  }
  0x82   :  { %2228 = vset.pattern.permute.xlu1 %v2285_v3  ;;  %688 = vperm.xlu0 %2243, %v2403_v14  }
  0x83   :  { %638 = vperm.xlu1 %2228, %v547_v44  }
  0x86   :  { %703 = vperm.xlu0 %2243, %v2531_v45  }
  0x87   :  { %2229 = vset.pattern.permute.xlu1 %v2284_v2 }
  0x88   :  { %820 = vperm.xlu1 %2229, %v547_v44  }
  0x8a   :  { %708 = vperm.xlu0 %2243, %v2416_v17   ;;  %v2286_v17 = vmov 0.0  }
  0x8c   :  { %824 = vperm.xlu1 %2229, %v548_v40   ;;  %v2541_v47 = vpop.permute.xlu1 %138  ;;  %v2543_v48 = vpop.permute.xlu0 %764  ;;  %v558_v40 = vld [vmem:[%s3328_s1 + $0xc8] sm:$0xff] }
  0x8d   :  { %vm197_vm2 = vcmp.eq.s32.totalorder %v2541_v47, %v2610_v13 }
  0x8e   :  { %723 = vperm.xlu0 %2243, %v2539_v46   ;;  %v1940_v23 = vsel %vm197_vm2, 1.0, %v2286_v17 }
  0x90   :  { %2230 = vset.pattern.permute.xlu1 %v2285_v3  ;;  %v142_v51 = vpop.permute.xlu1 %141  ;;  %v2553_v52 = vpop.permute.xlu0 %780 }
  0x91   :  { %653 = vperm.xlu1 %2230, %v550_v49   ;;  %vm198_vm1 = vcmp.eq.s32.totalorder %v142_v51, %v2610_v13 }
  0x92   :  { %84 = vperm.xlu0 %2243, %v49_v50   ;;  %v1941_v21 = vsel %vm198_vm1, 1.0, %v2286_v17  ;;  %v2678_v50 = vld [vmem:[%s3330_s3 + $0x1] ss:$0 sm:$0xff] }
  0x93   :  { %v284_v25 = vpack.c.bf16 %v1941_v21, %v1940_v23 }
  0x94   :  { %v2558_v54 = vpop.permute.xlu1 %147  ;;  %v2560_v55 = vpop.permute.xlu0 %796 }
  0x95   :  { %2231 = vset.pattern.permute.xlu1 %v2284_v2  ;;  %vm200_vm5 = vcmp.eq.s32.totalorder %v2558_v54, %v2610_v13  ;;  %v2689_v54 = vld [vmem:[%s3330_s3] ss:$0 sm:$0xff] }
  0x96   :  { %832 = vperm.xlu1 %2231, %v550_v49   ;;  %90 = vperm.xlu0 %2243, %v51_v53   ;;  %v1943_v30 = vsel %vm200_vm5, 1.0, %v2286_v17  ;;  %v2257_v49 = vld [vmem:[%s3332_s5 + $0x18] sm:$0xff]  }
  0x98   :  { %v2566_v57 = vpop.permute.xlu1 %153  ;;  %v2568_v58 = vpop.permute.xlu0 %812 }
  0x99   :  { %vm202_vm7 = vcmp.eq.s32.totalorder %v2566_v57, %v2610_v13 }
  0x9a   :  { %2232 = vset.pattern.permute.xlu1 %v2285_v3  ;;  %96 = vperm.xlu0 %2243, %v53_v56   ;;  %v1945_v35 = vsel %vm202_vm7, 1.0, %v2286_v17 }
  0x9b   :  { %658 = vperm.xlu1 %2232, %v551_v59  }
  0x9c   :  { %v2577_v61 = vpop.permute.xlu1 %159  ;;  %v2579_v62 = vpop.permute.xlu0 %828 }
  0x9d   :  { %vm204_vm9 = vcmp.eq.s32.totalorder %v2577_v61, %v2610_v13  ;;  %v2258_v61 = vld [vmem:[%s3332_s5 + $0x10] sm:$0xff]  }
  0x9e   :  { %102 = vperm.xlu0 %2243, %v55_v60  }
  0x9f   :  { %2233 = vset.pattern.permute.xlu1 %v2284_v2 }
  0xa0   :  { %836 = vperm.xlu1 %2233, %v551_v59   ;;  %v2585_v0 = vpop.permute.xlu1 %165  ;;  %v2587_v1 = vpop.permute.xlu0 %844 }
  0xa1   :  { %vm206_vm11 = vcmp.eq.s32.totalorder %v2585_v0, %v2610_v13 }
  0xa2   :  { %108 = vperm.xlu0 %2243, %v57_v63   ;;  %v1949_v51 = vsel %vm206_vm11, 1.0, %v2286_v17 }
  0xa4   :  { %840 = vperm.xlu1 %2233, %v552_v41   ;;  %v2592_v5 = vpop.permute.xlu1 %171  ;;  %v2594_v6 = vpop.permute.xlu0 %860  ;;  %v1947_v41 = vsel %vm204_vm9, 1.0, %v2286_v17 }
  0xa5   :  { %vm208_vm13 = vcmp.eq.s32.totalorder %v2592_v5, %v2610_v13 }
  0xa6   :  { %114 = vperm.xlu0 %2243, %v59_v4   ;;  %v1951_v63 = vsel %vm208_vm13, 1.0, %v2286_v17 }
  0xa8   :  { %2234 = vset.pattern.permute.xlu1 %v2285_v3  ;;  %v2603_v10 = vpop.permute.xlu1 %177  ;;  %v2605_v11 = vpop.permute.xlu0 %876 }
  0xa9   :  { %673 = vperm.xlu1 %2234, %v554_v7   ;;  %vm210_vm15 = vcmp.eq.s32.totalorder %v2603_v10, %v2610_v13  ;;  %v2717_v10 = vld [vmem:[%s3331_s4] ss:$0 sm:$0xff] }
  0xaa   :  { %120 = vperm.xlu0 %2243, %v61_v8  }
  0xac   :  { %v2612_v14 = vpop.permute.xlu1 %573 }
  0xad   :  { %2235 = vset.pattern.permute.xlu1 %v2284_v2  ;;  %v133_v15 = vpop.permute.xlu0 %132  ;;  %v731_v0 = vmul.f32 %v2689_v54, %v2612_v14  ;;  %v2259_v14 = vld [vmem:[%s3332_s5 + $0x8] sm:$0xff]  }
  0xae   :  { %vm195_vm0 = vcmp.eq.s32.totalorder %v133_v15, %v2610_v13  ;;  %848 = vperm.xlu1 %2235, %v554_v7   ;;  %126 = vperm.xlu0 %2243, %v63_v12   ;;  %v559_v7 = vld [vmem:[%s3328_s1 + $0xd0] sm:$0xff] }
  0xaf   :  { %v1938_v18 = vsel %vm195_vm0, 1.0, %v2286_v17 }
  0xb1   :  { %v2623_v19 = vpop.permute.xlu1 %768  ;;  %v136_v20 = vpop.permute.xlu0 %135 }
  0xb2   :  { %vm196_vm3 = vcmp.eq.s32.totalorder %v136_v20, %v2610_v13  ;;  %2236 = vset.pattern.permute.xlu1 %v2285_v3  ;;  %2248 = vset.pattern.permute.xlu0 %v2284_v2  ;;  %v896_v59 = vmul.f32 %v2678_v50, %v2623_v19  ;;  %v895_v20 = vmul.f32 %v2678_v50, %v2543_v48 }
  0xb3   :  { %v1939_v22 = vsel %vm196_vm3, 1.0, %v2286_v17  ;;  %678 = vperm.xlu1 %2236, %v555_v16  }
  0xb4   :  { %v283_v24 = vpack.c.bf16 %v1939_v22, %v1938_v18  ;;  %v928_v8 = vadd.f32 %v896_v59, %v731_v0 }
  0xb5   :  { %v145_v26 = vpop.permute.xlu0 %144 }
  0xb6   :  { %vm199_vm6 = vcmp.eq.s32.totalorder %v145_v26, %v2610_v13  ;;  %v2637_v29 = vpop.permute.xlu1 %578  ;;  %2089 = vmatprep.mubr.msk.bf16.mxu1 %vm323_vm4, %v283_v24  ;;  %v967_v22 = vadd.f32 %v2717_v10, %v928_v8  ;;  %v2260_v26 = vld [vmem:[%s3332_s5] sm:$0xff]  }
  0xb7   :  { %v1942_v31 = vsel %vm199_vm6, 1.0, %v2286_v17  ;;  %2237 = vset.pattern.permute.xlu1 %v2284_v2  ;;  %2090 = vmatmul.mubr.msk.bf16.vlgmr.msra.gmra.mxu1 %vm323_vm4, %v284_v25  ;;  %v732_v18 = vmul.f32 %v2689_v54, %v2637_v29 }
  0xb8   :  { %v285_v32 = vpack.c.bf16 %v1943_v30, %v1942_v31  ;;  %852 = vperm.xlu1 %2237, %v555_v16   ;;  %2106 = vmatpush3.bf16.msra.mxu1 %v2455_v28  ;;  %v1953_v16 = vsel %vm210_vm15, 1.0, %v2286_v17  ;;  %vm1000_vm1 = vcmp.ge.f32.partialorder %v967_v22, 0.0 }
  0xb9   :  { %v151_v33 = vpop.permute.xlu0 %150  ;;  %2107 = vmatprep.subr.bf16.mxu1 %v2254_v27 }
  0xba   :  { %vm201_vm8 = vcmp.eq.s32.totalorder %v151_v33, %v2610_v13  ;;  %2093 = vmatprep.mubr.msk.bf16.mxu1 %vm323_vm4, %v285_v32 }
  0xbb   :  { %v1944_v36 = vsel %vm201_vm8, 1.0, %v2286_v17  ;;  %v773_v37 = vpop.permute.xlu1 %772 }
  0xbc   :  { %v286_v38 = vpack.c.bf16 %v1945_v35, %v1944_v36  ;;  %856 = vperm.xlu1 %2237, %v2519_v43   ;;  %2108 = vmatpush3.bf16.msra.mxu1 %v2254_v27  ;;  %v897_v9 = vmul.f32 %v2678_v50, %v773_v37  ;;  %v2734_v27 = vstv %s2697_s18 }
  0xbd   :  { %v157_v28 = vpop.permute.xlu0 %156  ;;  %2109 = vmatprep.subr.bf16.mxu1 %v2255_v34  ;;  %v1033_v35 = vmul.f32 %v2734_v27, %v967_v22 }
  0xbe   :  { %vm203_vm10 = vcmp.eq.s32.totalorder %v157_v28, %v2610_v13  ;;  %v929_v23 = vadd.f32 %v897_v9, %v732_v18  ;;  %v899_v28 = vmul.f32 %v2678_v50, %v2553_v52 }
  0xbf   :  { %v1946_v42 = vsel %vm203_vm10, 1.0, %v2286_v17  ;;  %v2666_v44 = vpop.permute.xlu1 %776  ;;  %2094 = vmatmul.mubr.msk.bf16.gmra.mxu1 %vm323_vm4, %v286_v38 }
  0xc0   :  { %v287_v43 = vpack.c.bf16 %v1947_v41, %v1946_v42  ;;  %2238 = vset.pattern.permute.xlu1 %v2285_v3  ;;  %2110 = vmatpush3.bf16.msra.mxu1 %v2255_v34  ;;  %v968_v32 = vadd.f32 %v2717_v10, %v929_v23  ;;  %v898_v36 = vmul.f32 %v2678_v50, %v2666_v44 }
  0xc1   :  { %693 = vperm.xlu1 %2238, %v558_v40   ;;  %v163_v47 = vpop.permute.xlu0 %162  ;;  %2111 = vmatprep.subr.bf16.mxu1 %v2256_v39 }
  0xc2   :  { %vm205_vm12 = vcmp.eq.s32.totalorder %v163_v47, %v2610_v13  ;;  %2097 = vmatprep.mubr.msk.bf16.mxu1 %vm323_vm4, %v287_v43  ;;  %vm1001_vm3 = vcmp.ge.f32.partialorder %v968_v32, 0.0  ;;  %v1034_v44 = vmul.f32 %v2734_v27, %v968_v32 }
  0xc3   :  { %v1948_v53 = vsel %vm205_vm12, 1.0, %v2286_v17 }
  0xc4   :  { %v288_v56 = vpack.c.bf16 %v1949_v51, %v1948_v53  ;;  %v594_v57 = vpop.permute.xlu1 %593  ;;  %2112 = vmatpush3.bf16.msra.mxu1 %v2256_v39  ;;  %v1065_v51 = vsel %vm1000_vm1, %v967_v22, %v1033_v35  ;;  %v1066_v0 = vsel %vm1001_vm3, %v968_v32, %v1034_v44 }
  0xc5   :  { %2239 = vset.pattern.permute.xlu1 %v2284_v2  ;;  %v169_v60 = vpop.permute.xlu0 %168  ;;  %2113 = vmatprep.subr.bf16.mxu1 %v2257_v49  ;;  %v735_v48 = vmul.f32 %v2689_v54, %v594_v57  ;;  %v562_v57 = vld [vmem:[%s3328_s1 + $0xe8] sm:$0xff] }
  0xc6   :  { %vm207_vm14 = vcmp.eq.s32.totalorder %v169_v60, %v2610_v13  ;;  %864 = vperm.xlu1 %2239, %v558_v40  }
  0xc7   :  { %v1950_v4 = vsel %vm207_vm14, 1.0, %v2286_v17  ;;  %2098 = vmatmul.mubr.msk.bf16.gmra.mxu1 %vm323_vm4, %v288_v56 }
  0xc8   :  { %v289_v5 = vpack.c.bf16 %v1951_v63, %v1950_v4  ;;  %2114 = vmatpush3.bf16.msra.mxu1 %v2257_v49 }
  0xc9   :  { %v785_v12 = vpop.permute.xlu1 %784  ;;  %v175_v15 = vpop.permute.xlu0 %174  ;;  %2115 = vmatprep.subr.bf16.mxu1 %v2258_v61 }
  0xca   :  { %vm209_vm0 = vcmp.eq.s32.totalorder %v175_v15, %v2610_v13  ;;  %2240 = vset.pattern.permute.xlu1 %v2285_v3  ;;  %2101 = vmatprep.mubr.msk.bf16.mxu1 %vm323_vm4, %v289_v5  ;;  %v900_v24 = vmul.f32 %v2678_v50, %v785_v12 }
  0xcb   :  { %v1952_v19 = vsel %vm209_vm0, 1.0, %v2286_v17  ;;  %698 = vperm.xlu1 %2240, %v559_v7  }
  0xcc   :  { %v290_v21 = vpack.c.bf16 %v1953_v16, %v1952_v19  ;;  %2116 = vmatpush3.bf16.msra.mxu1 %v2258_v61  ;;  %v932_v33 = vadd.f32 %v900_v24, %v735_v48  ;;  %v903_v16 = vmul.f32 %v2678_v50, %v2560_v55  ;;  %v563_v48 = vld [vmem:[%s3328_s1 + $0xf0] sm:$0xff] }
  0xcd   :  { %v569_v25 = vpop.permute.xlu0 %568  ;;  %2117 = vmatprep.subr.bf16.mxu1 %v2259_v14 }
  0xce   :  { %v730_v29 = vmul.f32 %v2689_v54, %v569_v25  ;;  %v599_v30 = vpop.permute.xlu1 %598  ;;  %v971_v47 = vadd.f32 %v2717_v10, %v932_v33 }
  0xcf   :  { %2241 = vset.pattern.permute.xlu1 %v2284_v2  ;;  %2102 = vmatmul.mubr.msk.bf16.gmra.mxu1 %vm323_vm4, %v290_v21  ;;  %v736_v39 = vmul.f32 %v2689_v54, %v599_v30 }
  0xd0   :  { %v927_v31 = vadd.f32 %v895_v20, %v730_v29  ;;  %868 = vperm.xlu1 %2241, %v559_v7   ;;  %2118 = vmatpush3.bf16.msra.mxu1 %v2259_v14  ;;  %vm1004_vm6 = vcmp.ge.f32.partialorder %v971_v47, 0.0  ;;  %v1037_v7 = vmul.f32 %v2734_v27, %v971_v47 }
  0xd1   :  { %v584_v34 = vpop.permute.xlu0 %583  ;;  %2119 = vmatprep.subr.bf16.mxu1 %v2260_v26 }
  0xd2   :  { %v966_v37 = vadd.f32 %v2717_v10, %v927_v31  ;;  %v733_v38 = vmul.f32 %v2689_v54, %v584_v34  ;;  %v1069_v22 = vsel %vm1004_vm6, %v971_v47, %v1037_v7 }
  0xd3   :  { %v789_v40 = vpop.permute.xlu1 %788 }
  0xd4   :  { %v1032_v41 = vmul.f32 %v2734_v27, %v966_v37  ;;  %v930_v42 = vadd.f32 %v898_v36, %v733_v38  ;;  %v901_v43 = vmul.f32 %v2678_v50, %v789_v40  ;;  %872 = vperm.xlu1 %2241, %v2531_v45   ;;  %vm999_vm2 = vcmp.ge.f32.partialorder %v966_v37, 0.0  ;;  %2120 = vmatpush3.bf16.msra.mxu1 %v2260_v26 }
  0xd5   :  { %v589_v49 = vpop.permute.xlu0 %588 }
  0xd6   :  { %v969_v52 = vadd.f32 %v2717_v10, %v930_v42  ;;  %v933_v53 = vadd.f32 %v901_v43, %v736_v39  ;;  %v734_v56 = vmul.f32 %v2689_v54, %v589_v49  ;;  %v1064_v59 = vsel %vm999_vm2, %v966_v37, %v1032_v41 }
  0xd7   :  { %v793_v45 = vpop.permute.xlu1 %792  ;;  %v1096_v60 = vpack.c.bf16 %v1065_v51, %v1064_v59 }
  0xd8   :  { %vm1002_vm5 = vcmp.ge.f32.partialorder %v969_v52, 0.0  ;;  %v1035_v61 = vmul.f32 %v2734_v27, %v969_v52  ;;  %v931_v63 = vadd.f32 %v899_v28, %v734_v56  ;;  %2242 = vset.pattern.permute.xlu1 %v2285_v3  ;;  %v972_v4 = vadd.f32 %v2717_v10, %v933_v53 }
  0xd9   :  { %713 = vperm.xlu1 %2242, %v562_v57   ;;  %2121 = vmatprep.mubr.bf16.mxu1 %v1096_v60  ;;  %v604_v5 = vpop.permute.xlu0 %603  ;;  %v902_v12 = vmul.f32 %v2678_v50, %v793_v45 }
  0xda   :  { %v1067_v8 = vsel %vm1002_vm5, %v969_v52, %v1035_v61  ;;  %v970_v9 = vadd.f32 %v2717_v10, %v931_v63  ;;  %v737_v15 = vmul.f32 %v2689_v54, %v604_v5  ;;  %v1038_v26 = vmul.f32 %v2734_v27, %v972_v4 }
  0xdb   :  { %v1097_v14 = vpack.c.bf16 %v1067_v8, %v1066_v0  ;;  %vm1005_vm8 = vcmp.ge.f32.partialorder %v972_v4, 0.0  ;;  %v52_v0 = vld [vmem:[%s3327_s0 + $0x18] sm:$0xff] }
  0xdc   :  { %v1036_v18 = vmul.f32 %v2734_v27, %v970_v9  ;;  %v934_v19 = vadd.f32 %v902_v12, %v737_v15  ;;  %v614_v20 = vpop.permute.xlu1 %613  ;;  %vm1003_vm7 = vcmp.ge.f32.partialorder %v970_v9, 0.0  ;;  %v1070_v35 = vsel %vm1005_vm8, %v972_v4, %v1038_v26 }
  0xdd   :  { %2244 = vset.pattern.permute.xlu1 %v2284_v2  ;;  %2122 = vmatmul.mubr.bf16.vlgmr.msra.gmra.mxu1 %v1097_v14  ;;  %v609_v21 = vpop.permute.xlu0 %608  ;;  %v739_v31 = vmul.f32 %v2689_v54, %v614_v20  ;;  %v56_v20 = vld [vmem:[%s3327_s0 + $0x38] sm:$0xff] }
  0xde   :  { %v973_v23 = vadd.f32 %v2717_v10, %v934_v19  ;;  %v738_v24 = vmul.f32 %v2689_v54, %v609_v21  ;;  %880 = vperm.xlu1 %2244, %v562_v57   ;;  %v1068_v25 = vsel %vm1003_vm7, %v970_v9, %v1036_v18 }
  0xdf   :  { %v1098_v29 = vpack.c.bf16 %v1069_v22, %v1068_v25  ;;  %v58_v25 = vld [vmem:[%s3327_s0 + $0x48] sm:$0xff] }
  0xe0   :  { %v1039_v55 = vmul.f32 %v2734_v27, %v973_v23  ;;  %v935_v30 = vadd.f32 %v903_v16, %v738_v24  ;;  %vm1006_vm9 = vcmp.ge.f32.partialorder %v973_v23, 0.0 }
  0xe1   :  { %v801_v32 = vpop.permute.xlu1 %800  ;;  %2125 = vmatprep.mubr.bf16.mxu1 %v1098_v29  ;;  %v624_v44 = vpop.permute.xlu0 %623 }
  0xe2   :  { %v974_v33 = vadd.f32 %v2717_v10, %v935_v30  ;;  %v904_v34 = vmul.f32 %v2678_v50, %v801_v32  ;;  %2245 = vset.pattern.permute.xlu1 %v2285_v3  ;;  %v1071_v36 = vsel %vm1006_vm9, %v973_v23, %v1039_v55  ;;  %v741_v53 = vmul.f32 %v2689_v54, %v624_v44  ;;  %v2838_v44 = vld [vmem:[%s3334_s7 + $0x38] sm:$0xff]  }
  0xe3   :  { %718 = vperm.xlu1 %2245, %v563_v48   ;;  %v1099_v37 = vpack.c.bf16 %v1071_v36, %v1070_v35  ;;  %2153 = vmatprep.subr.bf16.mxu0 %v2838_v44 }
  0xe4   :  { %v1040_v38 = vmul.f32 %v2734_v27, %v974_v33  ;;  %v936_v28 = vadd.f32 %v904_v34, %v739_v31  ;;  %vm1007_vm10 = vcmp.ge.f32.partialorder %v974_v33, 0.0 }
  0xe5   :  { %2126 = vmatmul.mubr.bf16.gmra.mxu1 %v1099_v37  ;;  %v629_v60 = vpop.permute.xlu0 %628  ;;  %v62_v37 = vld [vmem:[%s3327_s0 + $0x68] sm:$0xff] }
  0xe6   :  { %v975_v39 = vadd.f32 %v2717_v10, %v936_v28  ;;  %v619_v40 = vpop.permute.xlu1 %618  ;;  %v1072_v42 = vsel %vm1007_vm10, %v974_v33, %v1040_v38  ;;  %v742_v61 = vmul.f32 %v2689_v54, %v629_v60 }
  0xe7   :  { %2246 = vset.pattern.permute.xlu1 %v2284_v2  ;;  %v740_v51 = vmul.f32 %v2689_v54, %v619_v40  ;;  %v50_v2 = vld [vmem:[%s3327_s0 + $0x8] sm:$0xff] }
  0xe8   :  { %884 = vperm.xlu1 %2246, %v563_v48   ;;  %vm1008_vm11 = vcmp.ge.f32.partialorder %v975_v39, 0.0  ;;  %v1041_v41 = vmul.f32 %v2734_v27, %v975_v39  ;;  %v60_v48 = vld [vmem:[%s3327_s0 + $0x58] sm:$0xff] }
  0xe9   :  { %v644_v29 = vpop.permute.xlu0 %643 }
  0xea   :  { %v1073_v43 = vsel %vm1008_vm11, %v975_v39, %v1041_v41  ;;  %v745_v35 = vmul.f32 %v2689_v54, %v644_v29 }
  0xeb   :  { %v805_v47 = vpop.permute.xlu1 %804  ;;  %v1100_v49 = vpack.c.bf16 %v1073_v43, %v1072_v42  ;;  %v64_v43 = vld [vmem:[%s3327_s0 + $0x78] sm:$0xff] }
  0xec   :  { %v905_v52 = vmul.f32 %v2678_v50, %v805_v47  ;;  %888 = vperm.xlu1 %2246, %v2539_v46   ;;  %v907_v46 = vmul.f32 %v2678_v50, %v2568_v58  ;;  %v54_v58 = vld [vmem:[%s3327_s0 + $0x28] sm:$0xff]  ;;  %v911_v47 = vmul.f32 %v2678_v50, %v2579_v62 }
  0xed   :  { %2129 = vmatprep.mubr.bf16.mxu1 %v1100_v49  ;;  %v649_v38 = vpop.permute.xlu0 %648 }
  0xee   :  { %v937_v56 = vadd.f32 %v905_v52, %v740_v51  ;;  %v746_v41 = vmul.f32 %v2689_v54, %v649_v38 }
  0xef   :  { %v809_v57 = vpop.permute.xlu1 %808 }
  0xf0   :  { %v976_v59 = vadd.f32 %v2717_v10, %v937_v56  ;;  %v906_v45 = vmul.f32 %v2678_v50, %v809_v57  ;;  %2247 = vset.pattern.permute.xlu1 %v2285_v3  ;;  %v939_v3 = vadd.f32 %v907_v46, %v742_v61 }
  0xf1   :  { %87 = vperm.xlu1 %2247, %v50_v2  }
  0xf2   :  { %v938_v63 = vadd.f32 %v906_v45, %v741_v53  ;;  %v1042_v7 = vmul.f32 %v2734_v27, %v976_v59  ;;  %vm1009_vm12 = vcmp.ge.f32.partialorder %v976_v59, 0.0  ;;  %v978_v16 = vadd.f32 %v2717_v10, %v939_v3 }
  0xf3   :  { %v943_v53 = vadd.f32 %v911_v47, %v746_v41 }
  0xf4   :  { %v977_v4 = vadd.f32 %v2717_v10, %v938_v63  ;;  %v634_v5 = vpop.permute.xlu1 %633  ;;  %v1074_v9 = vsel %vm1009_vm12, %v976_v59, %v1042_v7  ;;  %v1044_v22 = vmul.f32 %v2734_v27, %v978_v16  ;;  %vm1011_vm14 = vcmp.ge.f32.partialorder %v978_v16, 0.0  ;;  %v664_v7 = vpop.permute.xlu0 %663 }
  0xf5   :  { %93 = vperm.xlu1 %2247, %v52_v0   ;;  %v743_v18 = vmul.f32 %v2689_v54, %v634_v5  ;;  %v982_v60 = vadd.f32 %v2717_v10, %v943_v53 }
  0xf6   :  { %v1043_v8 = vmul.f32 %v2734_v27, %v977_v4  ;;  %vm1010_vm13 = vcmp.ge.f32.partialorder %v977_v4, 0.0  ;;  %v1076_v55 = vsel %vm1011_vm14, %v978_v16, %v1044_v22 }
  0xf7   :  { %v1048_v63 = vmul.f32 %v2734_v27, %v982_v60  ;;  %vm1015_vm2 = vcmp.ge.f32.partialorder %v982_v60, 0.0 }
  0xf8   :  { %v1075_v12 = vsel %vm1010_vm13, %v977_v4, %v1043_v8  ;;  %v669_v16 = vpop.permute.xlu0 %668 }
  0xf9   :  { %v817_v15 = vpop.permute.xlu1 %816  ;;  %99 = vperm.xlu1 %2247, %v54_v58   ;;  %v1101_v14 = vpack.c.bf16 %v1075_v12, %v1074_v9  ;;  %v1080_v3 = vsel %vm1015_vm2, %v982_v60, %v1048_v63  ;;  %v750_v22 = vmul.f32 %v2689_v54, %v669_v16 }
  0xfa   :  { %v908_v19 = vmul.f32 %v2678_v50, %v817_v15 }
  0xfb   :  { %2130 = vmatmul.mubr.bf16.gmra.mxu1 %v1101_v14 }
  0xfc   :  { %v940_v21 = vadd.f32 %v908_v19, %v743_v18  ;;  %v749_v19 = vmul.f32 %v2689_v54, %v664_v7 }
  0xfd   :  { %105 = vperm.xlu1 %2247, %v56_v20  }
  0xfe   :  { %v979_v23 = vadd.f32 %v2717_v10, %v940_v21  ;;  %v639_v24 = vpop.permute.xlu1 %638 }
  0xff   :  { %v744_v33 = vmul.f32 %v2689_v54, %v639_v24  ;;  %v915_v24 = vmul.f32 %v2678_v50, %v2587_v1 }
 0x100   :  { %v1045_v26 = vmul.f32 %v2734_v27, %v979_v23  ;;  %vm1012_vm15 = vcmp.ge.f32.partialorder %v979_v23, 0.0 }
 0x101   :  { %111 = vperm.xlu1 %2247, %v58_v25  }
 0x102   :  { %v1077_v30 = vsel %vm1012_vm15, %v979_v23, %v1045_v26 }
 0x103   :  { %v821_v31 = vpop.permute.xlu1 %820  ;;  %v1102_v32 = vpack.c.bf16 %v1077_v30, %v1076_v55  ;;  %v947_v55 = vadd.f32 %v915_v24, %v750_v22 }
 0x104   :  { %v909_v34 = vmul.f32 %v2678_v50, %v821_v31 }
 0x105   :  { %2133 = vmatprep.mubr.bf16.mxu1 %v1102_v32  ;;  %117 = vperm.xlu1 %2247, %v60_v48  }
 0x106   :  { %v941_v36 = vadd.f32 %v909_v34, %v744_v33  ;;  %v986_v34 = vadd.f32 %v2717_v10, %v947_v55 }
 0x107   :  { %v825_v28 = vpop.permute.xlu1 %824 }
 0x108   :  { %v980_v39 = vadd.f32 %v2717_v10, %v941_v36  ;;  %v910_v40 = vmul.f32 %v2678_v50, %v825_v28  ;;  %vm1019_vm7 = vcmp.ge.f32.partialorder %v986_v34, 0.0 }
 0x109   :  { %123 = vperm.xlu1 %2247, %v62_v37   ;;  %v1052_v37 = vmul.f32 %v2734_v27, %v986_v34 }
 0x10a   :  { %v942_v42 = vadd.f32 %v910_v40, %v745_v35  ;;  %v1046_v49 = vmul.f32 %v2734_v27, %v980_v39  ;;  %vm1013_vm0 = vcmp.ge.f32.partialorder %v980_v39, 0.0  ;;  %v684_v40 = vpop.permute.xlu0 %683 }
 0x10b   :  { %v1084_v41 = vsel %vm1019_vm7, %v986_v34, %v1052_v37  ;;  %v923_v34 = vmul.f32 %v2678_v50, %v2605_v11 }
 0x10c   :  { %v981_v51 = vadd.f32 %v2717_v10, %v942_v42  ;;  %v654_v52 = vpop.permute.xlu1 %653  ;;  %v1078_v2 = vsel %vm1013_vm0, %v980_v39, %v1046_v49 }
 0x10d   :  { %129 = vperm.xlu1 %2247, %v64_v43   ;;  %v747_v62 = vmul.f32 %v2689_v54, %v654_v52 }
 0x10e   :  { %v1047_v56 = vmul.f32 %v2734_v27, %v981_v51  ;;  %vm1014_vm1 = vcmp.ge.f32.partialorder %v981_v51, 0.0  ;;  %v689_v53 = vpop.permute.xlu0 %688 }
 0x110   :  { %v1079_v57 = vsel %vm1014_vm1, %v981_v51, %v1047_v56 }
 0x111   :  { %v833_v59 = vpop.permute.xlu1 %832  ;;  %v1103_v45 = vpack.c.bf16 %v1079_v57, %v1078_v2  ;;  %v753_v2 = vmul.f32 %v2689_v54, %v684_v40 }
 0x112   :  { %v912_v46 = vmul.f32 %v2678_v50, %v833_v59 }
 0x113   :  { %2134 = vmatmul.mubr.bf16.gmra.mxu1 %v1103_v45  ;;  %v754_v45 = vmul.f32 %v2689_v54, %v689_v53 }
 0x114   :  { %v944_v61 = vadd.f32 %v912_v46, %v747_v62  ;;  %v919_v62 = vmul.f32 %v2678_v50, %v2594_v6 }
 0x116   :  { %v983_v0 = vadd.f32 %v2717_v10, %v944_v61  ;;  %v659_v4 = vpop.permute.xlu1 %658 }
 0x117   :  { %v748_v12 = vmul.f32 %v2689_v54, %v659_v4 }
 0x118   :  { %v1049_v5 = vmul.f32 %v2734_v27, %v983_v0  ;;  %vm1016_vm3 = vcmp.ge.f32.partialorder %v983_v0, 0.0 }
 0x11a   :  { %v1081_v8 = vsel %vm1016_vm3, %v983_v0, %v1049_v5  ;;  %v951_v0 = vadd.f32 %v919_v62, %v754_v45 }
 0x11b   :  { %v837_v58 = vpop.permute.xlu1 %836  ;;  %v1104_v9 = vpack.c.bf16 %v1081_v8, %v1080_v3 }
 0x11c   :  { %v913_v15 = vmul.f32 %v2678_v50, %v837_v58  ;;  %v990_v58 = vadd.f32 %v2717_v10, %v951_v0 }
 0x11d   :  { %2137 = vmatprep.mubr.bf16.mxu1 %v1104_v9 }
 0x11e   :  { %v945_v14 = vadd.f32 %v913_v15, %v748_v12  ;;  %v1056_v15 = vmul.f32 %v2734_v27, %v990_v58  ;;  %vm1023_vm11 = vcmp.ge.f32.partialorder %v990_v58, 0.0 }
 0x11f   :  { %v841_v18 = vpop.permute.xlu1 %840 }
 0x120   :  { %v984_v20 = vadd.f32 %v2717_v10, %v945_v14  ;;  %v914_v21 = vmul.f32 %v2678_v50, %v841_v18  ;;  %v704_v18 = vpop.permute.xlu0 %703 }
 0x122   :  { %v946_v23 = vadd.f32 %v914_v21, %v749_v19  ;;  %v1050_v25 = vmul.f32 %v2734_v27, %v984_v20  ;;  %vm1017_vm5 = vcmp.ge.f32.partialorder %v984_v20, 0.0 }
 0x124   :  { %v985_v26 = vadd.f32 %v2717_v10, %v946_v23  ;;  %v674_v29 = vpop.permute.xlu1 %673  ;;  %v1082_v48 = vsel %vm1017_vm5, %v984_v20, %v1050_v25  ;;  %v1088_v20 = vsel %vm1023_vm11, %v990_v58, %v1056_v15 }
 0x125   :  { %v751_v35 = vmul.f32 %v2689_v54, %v674_v29 }
 0x126   :  { %v1051_v30 = vmul.f32 %v2734_v27, %v985_v26  ;;  %vm1018_vm6 = vcmp.ge.f32.partialorder %v985_v26, 0.0 }
 0x128   :  { %v1083_v31 = vsel %vm1018_vm6, %v985_v26, %v1051_v30  ;;  %v709_v26 = vpop.permute.xlu0 %708  ;;  %v757_v30 = vmul.f32 %v2689_v54, %v704_v18 }
 0x129   :  { %v849_v32 = vpop.permute.xlu1 %848  ;;  %v1105_v33 = vpack.c.bf16 %v1083_v31, %v1082_v48 }
 0x12a   :  { %v916_v1 = vmul.f32 %v2678_v50, %v849_v32  ;;  %v758_v32 = vmul.f32 %v2689_v54, %v709_v26 }
 0x12b   :  { %2138 = vmatmul.mubr.bf16.gmra.mxu1 %v1105_v33 }
 0x12c   :  { %v948_v36 = vadd.f32 %v916_v1, %v751_v35  ;;  %v724_v35 = vpop.permute.xlu0 %723 }
 0x12e   :  { %v987_v38 = vadd.f32 %v2717_v10, %v948_v36  ;;  %v679_v28 = vpop.permute.xlu1 %678 }
 0x12f   :  { %v752_v49 = vmul.f32 %v2689_v54, %v679_v28 }
 0x130   :  { %v1053_v39 = vmul.f32 %v2734_v27, %v987_v38  ;;  %vm1020_vm8 = vcmp.ge.f32.partialorder %v987_v38, 0.0 }
 0x132   :  { %v1085_v42 = vsel %vm1020_vm8, %v987_v38, %v1053_v39  ;;  %v955_v38 = vadd.f32 %v923_v34, %v758_v32 }
 0x133   :  { %v853_v43 = vpop.permute.xlu1 %852  ;;  %v1106_v47 = vpack.c.bf16 %v1085_v42, %v1084_v41 }
 0x134   :  { %v917_v51 = vmul.f32 %v2678_v50, %v853_v43  ;;  %v994_v43 = vadd.f32 %v2717_v10, %v955_v38 }
 0x135   :  { %2141 = vmatprep.mubr.bf16.mxu1 %v1106_v47  ;;  %v85_v47 = vpop.permute.xlu0 %84 }
 0x136   :  { %v949_v52 = vadd.f32 %v917_v51, %v752_v49  ;;  %vm1027_vm15 = vcmp.ge.f32.partialorder %v994_v43, 0.0  ;;  %vm179_vm1 = vcmp.eq.s32.totalorder %v85_v47, %v2610_v13 }
 0x137   :  { %v857_v56 = vpop.permute.xlu1 %856  ;;  %v1922_v15 = vsel %vm179_vm1, 1.0, %v2286_v17 }
 0x138   :  { %v988_v57 = vadd.f32 %v2717_v10, %v949_v52  ;;  %v918_v59 = vmul.f32 %v2678_v50, %v857_v56  ;;  %v1060_v52 = vmul.f32 %v2734_v27, %v994_v43 }
 0x13a   :  { %v950_v60 = vadd.f32 %v918_v59, %v753_v2  ;;  %v1054_v46 = vmul.f32 %v2734_v27, %v988_v57  ;;  %vm1021_vm9 = vcmp.ge.f32.partialorder %v988_v57, 0.0  ;;  %v91_v2 = vpop.permute.xlu0 %90  ;;  %v1092_v59 = vsel %vm1027_vm15, %v994_v43, %v1060_v52 }
 0x13b   :  { %vm181_vm6 = vcmp.eq.s32.totalorder %v91_v2, %v2610_v13 }
 0x13c   :  { %v989_v61 = vadd.f32 %v2717_v10, %v950_v60  ;;  %v694_v63 = vpop.permute.xlu1 %693  ;;  %v1086_v5 = vsel %vm1021_vm9, %v988_v57, %v1054_v46 }
 0x13d   :  { %v755_v9 = vmul.f32 %v2689_v54, %v694_v63 }
 0x13e   :  { %v1055_v4 = vmul.f32 %v2734_v27, %v989_v61  ;;  %vm1022_vm10 = vcmp.ge.f32.partialorder %v989_v61, 0.0  ;;  %v97_v63 = vpop.permute.xlu0 %96 }
 0x13f   :  { %vm183_vm8 = vcmp.eq.s32.totalorder %v97_v63, %v2610_v13 }
 0x140   :  { %v1087_v7 = vsel %vm1022_vm10, %v989_v61, %v1055_v4 }
 0x141   :  { %v865_v3 = vpop.permute.xlu1 %864  ;;  %v1107_v8 = vpack.c.bf16 %v1087_v7, %v1086_v5  ;;  %v761_v5 = vmul.f32 %v2689_v54, %v724_v35 }
 0x142   :  { %v920_v6 = vmul.f32 %v2678_v50, %v865_v3  ;;  %v103_v58 = vpop.permute.xlu0 %102 }
 0x143   :  { %2142 = vmatmul.mubr.bf16.gmra.mxu1 %v1107_v8  ;;  %vm185_vm10 = vcmp.eq.s32.totalorder %v103_v58, %v2610_v13 }
 0x144   :  { %v952_v12 = vadd.f32 %v920_v6, %v755_v9 }
 0x146   :  { %v991_v14 = vadd.f32 %v2717_v10, %v952_v12  ;;  %v699_v16 = vpop.permute.xlu1 %698 }
 0x147   :  { %v756_v24 = vmul.f32 %v2689_v54, %v699_v16 }
 0x148   :  { %v1057_v19 = vmul.f32 %v2734_v27, %v991_v14  ;;  %vm1024_vm12 = vcmp.ge.f32.partialorder %v991_v14, 0.0 }
 0x14a   :  { %v1089_v21 = vsel %vm1024_vm12, %v991_v14, %v1057_v19 }
 0x14b   :  { %v869_v22 = vpop.permute.xlu1 %868  ;;  %v1108_v23 = vpack.c.bf16 %v1089_v21, %v1088_v20  ;;  %v1924_v20 = vsel %vm181_vm6, 1.0, %v2286_v17  ;;  %v109_v21 = vpop.permute.xlu0 %108 }
 0x14c   :  { %v921_v25 = vmul.f32 %v2678_v50, %v869_v22  ;;  %vm187_vm12 = vcmp.eq.s32.totalorder %v109_v21, %v2610_v13 }
 0x14d   :  { %2145 = vmatprep.mubr.bf16.mxu1 %v1108_v23  ;;  %v2262_v23 = vld [vmem:[%s3334_s7 + $0x30] sm:$0xff]   ;;  %v1930_v38 = vsel %vm187_vm12, 1.0, %v2286_v17 }
 0x14e   :  { %v953_v29 = vadd.f32 %v921_v25, %v756_v24  ;;  %v1926_v25 = vsel %vm183_vm8, 1.0, %v2286_v17 }
 0x14f   :  { %v873_v55 = vpop.permute.xlu1 %872 }
 0x150   :  { %v992_v48 = vadd.f32 %v2717_v10, %v953_v29  ;;  %v922_v31 = vmul.f32 %v2678_v50, %v873_v55 }
 0x152   :  { %v954_v33 = vadd.f32 %v922_v31, %v757_v30  ;;  %v1058_v1 = vmul.f32 %v2734_v27, %v992_v48  ;;  %vm1025_vm13 = vcmp.ge.f32.partialorder %v992_v48, 0.0  ;;  %v2263_v30 = vld [vmem:[%s3334_s7 + $0x28] sm:$0xff]  }
 0x154   :  { %v993_v36 = vadd.f32 %v2717_v10, %v954_v33  ;;  %v714_v37 = vpop.permute.xlu1 %713  ;;  %v1090_v39 = vsel %vm1025_vm13, %v992_v48, %v1058_v1  ;;  %v115_v48 = vpop.permute.xlu0 %114  ;;  %v2264_v1 = vld [vmem:[%s3334_s7 + $0x20] sm:$0xff]  }
 0x155   :  { %v759_v11 = vmul.f32 %v2689_v54, %v714_v37 }
 0x156   :  { %v1059_v28 = vmul.f32 %v2734_v27, %v993_v36  ;;  %vm1026_vm14 = vcmp.ge.f32.partialorder %v993_v36, 0.0 }
 0x158   :  { %v1091_v40 = vsel %vm1026_vm14, %v993_v36, %v1059_v28  ;;  %v121_v28 = vpop.permute.xlu0 %120  ;;  %vm189_vm14 = vcmp.eq.s32.totalorder %v115_v48, %v2610_v13 }
 0x159   :  { %v881_v41 = vpop.permute.xlu1 %880  ;;  %v1109_v42 = vpack.c.bf16 %v1091_v40, %v1090_v39 }
 0x15a   :  { %v924_v49 = vmul.f32 %v2678_v50, %v881_v41 }
 0x15b   :  { %2146 = vmatmul.mubr.bf16.gmra.mxu1 %v1109_v42  ;;  %v2265_v42 = vld [vmem:[%s3334_s7 + $0x18] sm:$0xff]  }
 0x15c   :  { %v956_v51 = vadd.f32 %v924_v49, %v759_v11  ;;  %v1932_v11 = vsel %vm189_vm14, 1.0, %v2286_v17 }
 0x15e   :  { %v995_v53 = vadd.f32 %v2717_v10, %v956_v51  ;;  %v719_v56 = vpop.permute.xlu1 %718 }
 0x15f   :  { %v760_v46 = vmul.f32 %v2689_v54, %v719_v56  ;;  %v127_v56 = vpop.permute.xlu0 %126 }
 0x160   :  { %v1061_v57 = vmul.f32 %v2734_v27, %v995_v53  ;;  %vm1028_vm0 = vcmp.ge.f32.partialorder %v995_v53, 0.0 }
 0x162   :  { %v1093_v45 = vsel %vm1028_vm0, %v995_v53, %v1061_v57  ;;  %vm191_vm0 = vcmp.eq.s32.totalorder %v121_v28, %v2610_v13  ;;  %v2266_v53 = vld [vmem:[%s3334_s7 + $0x10] sm:$0xff]  }
 0x163   :  { %v885_v60 = vpop.permute.xlu1 %884  ;;  %v1110_v62 = vpack.c.bf16 %v1093_v45, %v1092_v59  ;;  %v1934_v59 = vsel %vm191_vm0, 1.0, %v2286_v17 }
 0x164   :  { %v925_v61 = vmul.f32 %v2678_v50, %v885_v60 }
 0x165   :  { %2149 = vmatprep.mubr.bf16.mxu1 %v1110_v62 }
 0x166   :  { %v957_v0 = vadd.f32 %v925_v61, %v760_v46  ;;  %v2267_v46 = vld [vmem:[%s3334_s7 + $0x8] sm:$0xff]  }
 0x167   :  { %v889_v4 = vpop.permute.xlu1 %888 }
 0x168   :  { %v996_v7 = vadd.f32 %v2717_v10, %v957_v0  ;;  %v926_v3 = vmul.f32 %v2678_v50, %v889_v4 }
 0x16a   :  { %v958_v8 = vadd.f32 %v926_v3, %v761_v5  ;;  %v1062_v9 = vmul.f32 %v2734_v27, %v996_v7  ;;  %vm1029_vm3 = vcmp.ge.f32.partialorder %v996_v7, 0.0  ;;  %v2268_v3 = vld [vmem:[%s3334_s7] sm:$0xff]  }
 0x16c   :  { %v997_v6 = vadd.f32 %v2717_v10, %v958_v8  ;;  %v88_v12 = vpop.permute.xlu1 %87  ;;  %v1094_v18 = vsel %vm1029_vm3, %v996_v7, %v1062_v9 }
 0x16d   :  { %vm180_vm2 = vcmp.eq.s32.totalorder %v88_v12, %v2610_v13  ;;  %v3008_v12 = vld [vmem:[%s3333_s6] ss:$0 sm:$0xff]  ;;  %s1996_s6 = sld [smem:[#allocation2 + $0x2]] }
 0x16e   :  { %v1063_v54 = vmul.f32 %v2734_v27, %v997_v6  ;;  %v1923_v14 = vsel %vm180_vm2, 1.0, %v2286_v17  ;;  %vm1030_vm5 = vcmp.ge.f32.partialorder %v997_v6, 0.0  ;;  %vm193_vm2 = vcmp.eq.s32.totalorder %v127_v56, %v2610_v13 }
 0x16f   :  { %v275_v50 = vpack.c.bf16 %v1923_v14, %v1922_v15  ;;  %v1936_v0 = vsel %vm193_vm2, 1.0, %v2286_v17 }
 0x170   :  { %v94_v16 = vpop.permute.xlu1 %93  ;;  %v1095_v19 = vsel %vm1030_vm5, %v997_v6, %v1063_v54 }
 0x171   :  { %vm182_vm7 = vcmp.eq.s32.totalorder %v94_v16, %v2610_v13  ;;  %2073 = vmatprep.mubr.msk.bf16.mxu0 %vm323_vm4, %v275_v50  ;;  %v1111_v10 = vpack.c.bf16 %v1095_v19, %v1094_v18  ;;  %v3012_v16 = vstv %s1986_s30 }
 0x172   :  { %v1925_v22 = vsel %vm182_vm7, 1.0, %v2286_v17 }
 0x173   :  { %v276_v27 = vpack.c.bf16 %v1925_v22, %v1924_v20  ;;  %2150 = vmatmul.mubr.bf16.gmra.mxu1 %v1111_v10 }
 0x174   :  { %v100_v24 = vpop.permute.xlu1 %99 }
 0x175   :  { %vm184_vm9 = vcmp.eq.s32.totalorder %v100_v24, %v2610_v13  ;;  %2074 = vmatmul.mubr.msk.bf16.vlgmr.msra.gmra.mxu0 %vm323_vm4, %v276_v27 }
 0x176   :  { %v1927_v26 = vsel %vm184_vm9, 1.0, %v2286_v17  ;;  %2154 = vmatpush3.bf16.msra.mxu0 %v2838_v44  ;;  %v1928_v44 = vsel %vm185_vm10, 1.0, %v2286_v17 }
 0x177   :  { %v277_v29 = vpack.c.bf16 %v1927_v26, %v1926_v25  ;;  %v2930_v55 = vpop.f32.mrf.mxu1  ;;  %2155 = vmatprep.subr.bf16.mxu0 %v2262_v23 }
 0x178   :  { %v106_v31 = vpop.permute.xlu1 %105 }
 0x179   :  { %vm186_vm11 = vcmp.eq.s32.totalorder %v106_v31, %v2610_v13  ;;  %2077 = vmatprep.mubr.msk.bf16.mxu0 %vm323_vm4, %v277_v29  ;;  %v2937_v32 = vpop.f32.mrf.mxu1 }
 0x17a   :  { %v1929_v33 = vsel %vm186_vm11, 1.0, %v2286_v17  ;;  %2156 = vmatpush3.bf16.msra.mxu0 %v2262_v23 }
 0x17b   :  { %v278_v34 = vpack.c.bf16 %v1929_v33, %v1928_v44  ;;  %v2942_v35 = vpop.f32.mrf.mxu1  ;;  %2157 = vmatprep.subr.bf16.mxu0 %v2263_v30 }
 0x17c   :  { %v112_v36 = vpop.permute.xlu1 %111 }
 0x17d   :  { %vm188_vm13 = vcmp.eq.s32.totalorder %v112_v36, %v2610_v13  ;;  %2078 = vmatmul.mubr.msk.bf16.gmra.mxu0 %vm323_vm4, %v278_v34  ;;  %v2949_v37 = vpop.f32.mrf.mxu1 }
 0x17e   :  { %v1931_v39 = vsel %vm188_vm13, 1.0, %v2286_v17  ;;  %2158 = vmatpush3.bf16.msra.mxu0 %v2263_v30 }
 0x17f   :  { %v279_v40 = vpack.c.bf16 %v1931_v39, %v1930_v38  ;;  %v2954_v41 = vpop.f32.mrf.mxu1  ;;  %2159 = vmatprep.subr.bf16.mxu0 %v2264_v1 }
 0x180   :  { %v118_v43 = vpop.permute.xlu1 %117 }
 0x181   :  { %vm190_vm15 = vcmp.eq.s32.totalorder %v118_v43, %v2610_v13  ;;  %2081 = vmatprep.mubr.msk.bf16.mxu0 %vm323_vm4, %v279_v40  ;;  %v2961_v47 = vpop.f32.mrf.mxu1 }
 0x182   :  { %v1933_v49 = vsel %vm190_vm15, 1.0, %v2286_v17  ;;  %2160 = vmatpush3.bf16.msra.mxu0 %v2264_v1 }
 0x183   :  { %v280_v51 = vpack.c.bf16 %v1933_v49, %v1932_v11  ;;  %v2966_v52 = vpop.f32.mrf.mxu1  ;;  %2161 = vmatprep.subr.bf16.mxu0 %v2265_v42 }
 0x184   :  { %v124_v2 = vpop.permute.xlu1 %123 }
 0x185   :  { %vm192_vm1 = vcmp.eq.s32.totalorder %v124_v2, %v2610_v13  ;;  %2082 = vmatmul.mubr.msk.bf16.gmra.mxu0 %vm323_vm4, %v280_v51  ;;  %v2973_v57 = vpop.f32.mrf.mxu1 }
 0x186   :  { %v1935_v45 = vsel %vm192_vm1, 1.0, %v2286_v17  ;;  %2162 = vmatpush3.bf16.msra.mxu0 %v2265_v42 }
 0x187   :  { %v281_v60 = vpack.c.bf16 %v1935_v45, %v1934_v59  ;;  %v2978_v62 = vpop.f32.mrf.mxu1  ;;  %2163 = vmatprep.subr.bf16.mxu0 %v2266_v53 }
 0x188   :  { %v130_v61 = vpop.permute.xlu1 %129 }
 0x189   :  { %vm194_vm3 = vcmp.eq.s32.totalorder %v130_v61, %v2610_v13  ;;  %2085 = vmatprep.mubr.msk.bf16.mxu0 %vm323_vm4, %v281_v60  ;;  %v2985_v63 = vpop.f32.mrf.mxu1 }
 0x18a   :  { %v1937_v4 = vsel %vm194_vm3, 1.0, %v2286_v17  ;;  %2164 = vmatpush3.bf16.msra.mxu0 %v2266_v53 }
 0x18b   :  { %v282_v5 = vpack.c.bf16 %v1937_v4, %v1936_v0  ;;  %v2989_v7 = vpop.f32.mrf.mxu1  ;;  %2165 = vmatprep.subr.bf16.mxu0 %v2267_v46 }
 0x18d   :  { %2086 = vmatmul.mubr.msk.bf16.gmra.mxu0 %vm323_vm4, %v282_v5  ;;  %v2995_v13 = vpop.f32.mrf.mxu1 }
 0x18e   :  { %2166 = vmatpush3.bf16.msra.mxu0 %v2267_v46 }
 0x18f   :  { %v2997_v8 = vpop.f32.mrf.mxu1  ;;  %2167 = vmatprep.subr.bf16.mxu0 %v2268_v3 }
 0x191   :  { %v2999_v58 = vpop.f32.mrf.mxu1 }
 0x192   :  { %2168 = vmatpush3.bf16.msra.mxu0 %v2268_v3 }
 0x193   :  { %v3001_v17 = vpop.f32.mrf.mxu1 }
 0x195   :  { %v3003_v9 = vpop.f32.mrf.mxu1 }
 0x19d   :  { %v2123_v6 = vpop.f32.mrf.mxu1 }
 0x19e   :  { %v1226_v14 = vadd.f32 %v2123_v6, %v3008_v12 }
 0x19f   :  { %v1217_v15 = vpop.f32.mrf.mxu1 }
 0x1a0   :  { %v1218_v54 = vadd.f32 %v3008_v12, %v1217_v15  ;;  %v1380_v22 = vmul.f32 %v3012_v16, %v1226_v14  ;;  %vm1347_vm6 = vcmp.ge.f32.partialorder %v1226_v14, 0.0 }
 0x1a1   :  { %v2124_v50 = vpop.f32.mrf.mxu1 }
 0x1a2   :  { %v1229_v18 = vadd.f32 %v2124_v50, %v3008_v12  ;;  %v1378_v10 = vmul.f32 %v3012_v16, %v1218_v54  ;;  %vm1345_vm5 = vcmp.ge.f32.partialorder %v1218_v54, 0.0  ;;  %v1412_v48 = vsel %vm1347_vm6, %v1226_v14, %v1380_v22 }
 0x1a3   :  { %v1220_v19 = vpop.f32.mrf.mxu1 }
 0x1a4   :  { %vm1348_vm4 = vcmp.ge.f32.partialorder %v1229_v18, 0.0  ;;  %v1381_v20 = vmul.f32 %v3012_v16, %v1229_v18  ;;  %v1221_v21 = vadd.f32 %v3008_v12, %v1220_v19  ;;  %v1410_v29 = vsel %vm1345_vm5, %v1218_v54, %v1378_v10 }
 0x1a5   :  { %v2127_v27 = vpop.f32.mrf.mxu1 }
 0x1a6   :  { %vm1346_vm7 = vcmp.ge.f32.partialorder %v1221_v21, 0.0  ;;  %v1379_v23 = vmul.f32 %v3012_v16, %v1221_v21  ;;  %v1413_v24 = vsel %vm1348_vm4, %v1229_v18, %v1381_v20  ;;  %v1242_v31 = vadd.f32 %v2127_v27, %v3008_v12 }
 0x1a7   :  { %v1233_v25 = vpop.f32.mrf.mxu1  ;;  %v1443_v34 = vpack.c.bf16 %v1413_v24, %v1412_v48 }
 0x1a8   :  { %v1234_v26 = vadd.f32 %v3008_v12, %v1233_v25  ;;  %v1411_v30 = vsel %vm1346_vm7, %v1221_v21, %v1379_v23  ;;  %v1384_v40 = vmul.f32 %v3012_v16, %v1242_v31  ;;  %vm1351_vm10 = vcmp.ge.f32.partialorder %v1242_v31, 0.0 }
 0x1a9   :  { %v2128_v44 = vpop.f32.mrf.mxu1  ;;  %v1442_v33 = vpack.c.bf16 %v1411_v30, %v1410_v29 }
 0x1aa   :  { %v1245_v1 = vadd.f32 %v2128_v44, %v3008_v12  ;;  %v1382_v38 = vmul.f32 %v3012_v16, %v1234_v26  ;;  %vm1349_vm9 = vcmp.ge.f32.partialorder %v1234_v26, 0.0  ;;  %v1416_v53 = vsel %vm1351_vm10, %v1242_v31, %v1384_v40 }
 0x1ab   :  { %v1236_v36 = vpop.f32.mrf.mxu1  ;;  %2169 = vmatprep.mubr.bf16.mxu0 %v1442_v33 }
 0x1ac   :  { %vm1352_vm8 = vcmp.ge.f32.partialorder %v1245_v1, 0.0  ;;  %v1385_v28 = vmul.f32 %v3012_v16, %v1245_v1  ;;  %v1237_v39 = vadd.f32 %v3008_v12, %v1236_v36  ;;  %2170 = vmatmul.mubr.bf16.vlgmr.msra.gmra.mxu0 %v1443_v34  ;;  %v1414_v11 = vsel %vm1349_vm9, %v1234_v26, %v1382_v38 }
 0x1ae   :  { %vm1350_vm11 = vcmp.ge.f32.partialorder %v1237_v39, 0.0  ;;  %v1383_v42 = vmul.f32 %v3012_v16, %v1237_v39  ;;  %v1417_v43 = vsel %vm1352_vm8, %v1245_v1, %v1385_v28 }
 0x1af   :  { %v1445_v56 = vpack.c.bf16 %v1417_v43, %v1416_v53 }
 0x1b0   :  { %v1415_v49 = vsel %vm1350_vm11, %v1237_v39, %v1383_v42 }
 0x1b1   :  { %v1444_v51 = vpack.c.bf16 %v1415_v49, %v1414_v11 }
 0x1b3   :  { %2173 = vmatprep.mubr.bf16.mxu0 %v1444_v51 }
 0x1b4   :  { %2174 = vmatmul.mubr.bf16.gmra.mxu0 %v1445_v56 }
 0x1bb   :  { %v2131_v2 = vpop.f32.mrf.mxu1 }
 0x1bc   :  { %v1258_v60 = vadd.f32 %v2131_v2, %v3008_v12 }
 0x1bd   :  { %v1249_v59 = vpop.f32.mrf.mxu1 }
 0x1be   :  { %v1250_v45 = vadd.f32 %v3008_v12, %v1249_v59  ;;  %v1388_v6 = vmul.f32 %v3012_v16, %v1258_v60  ;;  %vm1355_vm14 = vcmp.ge.f32.partialorder %v1258_v60, 0.0 }
 0x1bf   :  { %v2132_v46 = vpop.f32.mrf.mxu1 }
 0x1c0   :  { %v1261_v61 = vadd.f32 %v2132_v46, %v3008_v12  ;;  %v1386_v4 = vmul.f32 %v3012_v16, %v1250_v45  ;;  %vm1353_vm13 = vcmp.ge.f32.partialorder %v1250_v45, 0.0  ;;  %v1420_v19 = vsel %vm1355_vm14, %v1258_v60, %v1388_v6 }
 0x1c1   :  { %v1252_v0 = vpop.f32.mrf.mxu1 }
 0x1c2   :  { %vm1356_vm12 = vcmp.ge.f32.partialorder %v1261_v61, 0.0  ;;  %v1389_v5 = vmul.f32 %v3012_v16, %v1261_v61  ;;  %v1253_v3 = vadd.f32 %v3008_v12, %v1252_v0  ;;  %v1418_v14 = vsel %vm1353_vm13, %v1250_v45, %v1386_v4 }
 0x1c4   :  { %vm1354_vm15 = vcmp.ge.f32.partialorder %v1253_v3, 0.0  ;;  %v1387_v15 = vmul.f32 %v3012_v16, %v1253_v3  ;;  %v1421_v54 = vsel %vm1356_vm12, %v1261_v61, %v1389_v5 }
 0x1c5   :  { %v1447_v10 = vpack.c.bf16 %v1421_v54, %v1420_v19 }
 0x1c6   :  { %v1419_v50 = vsel %vm1354_vm15, %v1253_v3, %v1387_v15 }
 0x1c7   :  { %v1446_v18 = vpack.c.bf16 %v1419_v50, %v1418_v14 }
 0x1c9   :  { %2177 = vmatprep.mubr.bf16.mxu0 %v1446_v18 }
 0x1ca   :  { %2178 = vmatmul.mubr.bf16.gmra.mxu0 %v1447_v10 }
 0x1d3   :  { %v2135_v20 = vpop.f32.mrf.mxu1 }
 0x1d4   :  { %v1274_v27 = vadd.f32 %v2135_v20, %v3008_v12 }
 0x1d5   :  { %v1265_v21 = vpop.f32.mrf.mxu1 }
 0x1d6   :  { %v1266_v22 = vadd.f32 %v3008_v12, %v1265_v21  ;;  %v1392_v48 = vmul.f32 %v3012_v16, %v1274_v27  ;;  %vm1359_vm2 = vcmp.ge.f32.partialorder %v1274_v27, 0.0 }
 0x1d7   :  { %v2136_v23 = vpop.f32.mrf.mxu1 }
 0x1d8   :  { %v1277_v24 = vadd.f32 %v2136_v23, %v3008_v12  ;;  %v1390_v26 = vmul.f32 %v3012_v16, %v1266_v22  ;;  %vm1357_vm1 = vcmp.ge.f32.partialorder %v1266_v22, 0.0  ;;  %v1424_v36 = vsel %vm1359_vm2, %v1274_v27, %v1392_v48 }
 0x1d9   :  { %v1268_v25 = vpop.f32.mrf.mxu1 }
 0x1da   :  { %vm1360_vm0 = vcmp.ge.f32.partialorder %v1277_v24, 0.0  ;;  %v1393_v29 = vmul.f32 %v3012_v16, %v1277_v24  ;;  %v1269_v30 = vadd.f32 %v3008_v12, %v1268_v25  ;;  %v1422_v33 = vsel %vm1357_vm1, %v1266_v22, %v1390_v26 }
 0x1dc   :  { %vm1358_vm3 = vcmp.ge.f32.partialorder %v1269_v30, 0.0  ;;  %v1391_v31 = vmul.f32 %v3012_v16, %v1269_v30  ;;  %v1425_v44 = vsel %vm1360_vm0, %v1277_v24, %v1393_v29 }
 0x1dd   :  { %v1449_v38 = vpack.c.bf16 %v1425_v44, %v1424_v36 }
 0x1de   :  { %v1423_v34 = vsel %vm1358_vm3, %v1269_v30, %v1391_v31 }
 0x1df   :  { %v1448_v1 = vpack.c.bf16 %v1423_v34, %v1422_v33 }
 0x1e1   :  { %2181 = vmatprep.mubr.bf16.mxu0 %v1448_v1 }
 0x1e2   :  { %2182 = vmatmul.mubr.bf16.gmra.mxu0 %v1449_v38 }
 0x1eb   :  { %v2139_v28 = vpop.f32.mrf.mxu1 }
 0x1ec   :  { %v1290_v42 = vadd.f32 %v2139_v28, %v3008_v12 }
 0x1ed   :  { %v1281_v39 = vpop.f32.mrf.mxu1 }
 0x1ee   :  { %v1282_v40 = vadd.f32 %v3008_v12, %v1281_v39  ;;  %v1396_v2 = vmul.f32 %v3012_v16, %v1290_v42  ;;  %vm1363_vm6 = vcmp.ge.f32.partialorder %v1290_v42, 0.0 }
 0x1ef   :  { %v2140_v43 = vpop.f32.mrf.mxu1 }
 0x1f0   :  { %v1293_v11 = vadd.f32 %v2140_v43, %v3008_v12  ;;  %v1394_v51 = vmul.f32 %v3012_v16, %v1282_v40  ;;  %vm1361_vm5 = vcmp.ge.f32.partialorder %v1282_v40, 0.0  ;;  %v1428_v0 = vsel %vm1363_vm6, %v1290_v42, %v1396_v2 }
 0x1f1   :  { %v1284_v49 = vpop.f32.mrf.mxu1 }
 0x1f2   :  { %vm1364_vm4 = vcmp.ge.f32.partialorder %v1293_v11, 0.0  ;;  %v1397_v53 = vmul.f32 %v3012_v16, %v1293_v11  ;;  %v1285_v56 = vadd.f32 %v3008_v12, %v1284_v49  ;;  %v1426_v60 = vsel %vm1361_vm5, %v1282_v40, %v1394_v51 }
 0x1f4   :  { %vm1362_vm7 = vcmp.ge.f32.partialorder %v1285_v56, 0.0  ;;  %v1395_v59 = vmul.f32 %v3012_v16, %v1285_v56  ;;  %v1429_v45 = vsel %vm1364_vm4, %v1293_v11, %v1397_v53 }
 0x1f5   :  { %v1451_v4 = vpack.c.bf16 %v1429_v45, %v1428_v0 }
 0x1f6   :  { %v1427_v46 = vsel %vm1362_vm7, %v1285_v56, %v1395_v59 }
 0x1f7   :  { %v1450_v61 = vpack.c.bf16 %v1427_v46, %v1426_v60 }
 0x1f9   :  { %2185 = vmatprep.mubr.bf16.mxu0 %v1450_v61 }
 0x1fa   :  { %2186 = vmatmul.mubr.bf16.gmra.mxu0 %v1451_v4 }
 0x203   :  { %v2143_v5 = vpop.f32.mrf.mxu1 }
 0x204   :  { %v1306_v15 = vadd.f32 %v2143_v5, %v3008_v12 }
 0x205   :  { %v1297_v3 = vpop.f32.mrf.mxu1 }
 0x206   :  { %v1298_v6 = vadd.f32 %v3008_v12, %v1297_v3  ;;  %v1400_v20 = vmul.f32 %v3012_v16, %v1306_v15  ;;  %vm1367_vm10 = vcmp.ge.f32.partialorder %v1306_v15, 0.0 }
 0x207   :  { %v2144_v54 = vpop.f32.mrf.mxu1 }
 0x208   :  { %v1309_v14 = vadd.f32 %v2144_v54, %v3008_v12  ;;  %v1398_v18 = vmul.f32 %v3012_v16, %v1298_v6  ;;  %vm1365_vm9 = vcmp.ge.f32.partialorder %v1298_v6, 0.0  ;;  %v1432_v25 = vsel %vm1367_vm10, %v1306_v15, %v1400_v20 }
 0x209   :  { %v1300_v50 = vpop.f32.mrf.mxu1 }
 0x20a   :  { %vm1368_vm8 = vcmp.ge.f32.partialorder %v1309_v14, 0.0  ;;  %v1401_v19 = vmul.f32 %v3012_v16, %v1309_v14  ;;  %v1301_v10 = vadd.f32 %v3008_v12, %v1300_v50  ;;  %v1430_v27 = vsel %vm1365_vm9, %v1298_v6, %v1398_v18 }
 0x20c   :  { %vm1366_vm11 = vcmp.ge.f32.partialorder %v1301_v10, 0.0  ;;  %v1399_v21 = vmul.f32 %v3012_v16, %v1301_v10  ;;  %v1433_v22 = vsel %vm1368_vm8, %v1309_v14, %v1401_v19 }
 0x20d   :  { %v1453_v26 = vpack.c.bf16 %v1433_v22, %v1432_v25 }
 0x20e   :  { %v1431_v23 = vsel %vm1366_vm11, %v1301_v10, %v1399_v21 }
 0x20f   :  { %v1452_v24 = vpack.c.bf16 %v1431_v23, %v1430_v27 }
 0x211   :  { %2189 = vmatprep.mubr.bf16.mxu0 %v1452_v24 }
 0x212   :  { %2190 = vmatmul.mubr.bf16.gmra.mxu0 %v1453_v26 }
 0x21b   :  { %v2147_v29 = vpop.f32.mrf.mxu1 }
 0x21c   :  { %v1322_v31 = vadd.f32 %v2147_v29, %v3008_v12 }
 0x21d   :  { %v1313_v30 = vpop.f32.mrf.mxu1 }
 0x21e   :  { %v1314_v48 = vadd.f32 %v3008_v12, %v1313_v30  ;;  %v1404_v28 = vmul.f32 %v3012_v16, %v1322_v31  ;;  %vm1371_vm14 = vcmp.ge.f32.partialorder %v1322_v31, 0.0 }
 0x21f   :  { %v2148_v44 = vpop.f32.mrf.mxu1 }
 0x220   :  { %v1325_v33 = vadd.f32 %v2148_v44, %v3008_v12  ;;  %v1402_v1 = vmul.f32 %v3012_v16, %v1314_v48  ;;  %vm1369_vm13 = vcmp.ge.f32.partialorder %v1314_v48, 0.0  ;;  %v1436_v49 = vsel %vm1371_vm14, %v1322_v31, %v1404_v28  ;;  %v3103_v44 = vld [vmem:[%s3335_s8] ss:$0 sm:$0xff] }
 0x221   :  { %v1316_v34 = vpop.f32.mrf.mxu1 }
 0x222   :  { %vm1372_vm12 = vcmp.ge.f32.partialorder %v1325_v33, 0.0  ;;  %v1405_v36 = vmul.f32 %v3012_v16, %v1325_v33  ;;  %v1317_v38 = vadd.f32 %v3008_v12, %v1316_v34  ;;  %v1434_v42 = vsel %vm1369_vm13, %v1314_v48, %v1402_v1 }
 0x223   :  { %v3105_v34 = vstv %s1996_s6 }
 0x224   :  { %vm1370_vm15 = vcmp.ge.f32.partialorder %v1317_v38, 0.0  ;;  %v1403_v39 = vmul.f32 %v3012_v16, %v1317_v38  ;;  %v1437_v40 = vsel %vm1372_vm12, %v1325_v33, %v1405_v36 }
 0x225   :  { %v1455_v51 = vpack.c.bf16 %v1437_v40, %v1436_v49 }
 0x226   :  { %v1435_v43 = vsel %vm1370_vm15, %v1317_v38, %v1403_v39 }
 0x227   :  { %v1454_v11 = vpack.c.bf16 %v1435_v43, %v1434_v42 }
 0x229   :  { %2193 = vmatprep.mubr.bf16.mxu0 %v1454_v11 }
 0x22a   :  { %2194 = vmatmul.mubr.bf16.gmra.mxu0 %v1455_v51 }
 0x233   :  { %v2151_v53 = vpop.f32.mrf.mxu1 }
 0x234   :  { %v1338_v45 = vadd.f32 %v2151_v53, %v3008_v12 }
 0x235   :  { %v2075_v56 = vpop.f32.mrf.mxu0  ;;  %v1329_v2 = vpop.f32.mrf.mxu1 }
 0x236   :  { %v1330_v59 = vadd.f32 %v3008_v12, %v1329_v2  ;;  %v1408_v15 = vmul.f32 %v3012_v16, %v1338_v45  ;;  %vm1375_vm2 = vcmp.ge.f32.partialorder %v1338_v45, 0.0 }
 0x237   :  { %v406_v60 = vpop.f32.mrf.mxu0  ;;  %v2152_v46 = vpop.f32.mrf.mxu1 }
 0x238   :  { %v1341_v61 = vadd.f32 %v2152_v46, %v3008_v12  ;;  %v1406_v5 = vmul.f32 %v3012_v16, %v1330_v59  ;;  %vm1373_vm1 = vcmp.ge.f32.partialorder %v1330_v59, 0.0  ;;  %v1440_v21 = vsel %vm1375_vm2, %v1338_v45, %v1408_v15 }
 0x239   :  { %v3071_v0 = vpop.f32.mrf.mxu0  ;;  %v1332_v4 = vpop.f32.mrf.mxu1 }
 0x23a   :  { %vm1376_vm0 = vcmp.ge.f32.partialorder %v1341_v61, 0.0  ;;  %v1409_v3 = vmul.f32 %v3012_v16, %v1341_v61  ;;  %v1333_v6 = vadd.f32 %v3008_v12, %v1332_v4  ;;  %v1438_v19 = vsel %vm1373_vm1, %v1330_v59, %v1406_v5 }
 0x23b   :  { %v409_v54 = vpop.f32.mrf.mxu0 }
 0x23c   :  { %vm1374_vm3 = vcmp.ge.f32.partialorder %v1333_v6, 0.0  ;;  %v1407_v14 = vmul.f32 %v3012_v16, %v1333_v6  ;;  %v1441_v50 = vsel %vm1376_vm0, %v1341_v61, %v1409_v3 }
 0x23d   :  { %v3078_v18 = vpop.f32.mrf.mxu0  ;;  %v1457_v22 = vpack.c.bf16 %v1441_v50, %v1440_v21 }
 0x23e   :  { %v1439_v10 = vsel %vm1374_vm3, %v1333_v6, %v1407_v14 }
 0x23f   :  { %v1456_v20 = vpack.c.bf16 %v1439_v10, %v1438_v19  ;;  %v3080_v27 = vpop.f32.mrf.mxu0 }
 0x241   :  { %2197 = vmatprep.mubr.bf16.mxu0 %v1456_v20  ;;  %v2080_v12 = vpop.f32.mrf.mxu0 }
 0x242   :  { %2198 = vmatmul.mubr.bf16.gmra.mxu0 %v1457_v22 }
 0x243   :  { %v3082_v23 = vpop.f32.mrf.mxu0 }
 0x245   :  { %v3084_v24 = vpop.f32.mrf.mxu0 }
 0x247   :  { %v3086_v25 = vpop.f32.mrf.mxu0 }
 0x249   :  { %v3088_v16 = vpop.f32.mrf.mxu0 }
 0x24b   :  { %v3090_v26 = vpop.f32.mrf.mxu0 }
 0x24d   :  { %v3092_v29 = vpop.f32.mrf.mxu0 }
 0x24f   :  { %v3094_v30 = vpop.f32.mrf.mxu0 }
 0x251   :  { %v3096_v48 = vpop.f32.mrf.mxu0 }
 0x253   :  { %v3098_v31 = vpop.f32.mrf.mxu0 }
 0x26c   :  { %v2171_v33 = vpop.f32.mrf.mxu0 }
 0x26d   :  { %v1572_v1 = vadd.f32 %v2171_v33, %v3103_v44 }
 0x26e   :  { %v1563_v36 = vpop.f32.mrf.mxu0 }
 0x26f   :  { %v1726_v38 = vmul.f32 %v3105_v34, %v1572_v1  ;;  %v1564_v28 = vadd.f32 %v3103_v44, %v1563_v36  ;;  %vm1693_vm4 = vcmp.ge.f32.partialorder %v1572_v1, 0.0 }
 0x270   :  { %v2172_v39 = vpop.f32.mrf.mxu0 }
 0x271   :  { %v1724_v40 = vmul.f32 %v3105_v34, %v1564_v28  ;;  %v1575_v42 = vadd.f32 %v2172_v39, %v3103_v44  ;;  %v1758_v43 = vsel %vm1693_vm4, %v1572_v1, %v1726_v38  ;;  %vm1691_vm5 = vcmp.ge.f32.partialorder %v1564_v28, 0.0 }
 0x272   :  { %v1566_v11 = vpop.f32.mrf.mxu0  ;;  %v1790_v49 = vmul.f32 %v2075_v56, %v1758_v43 }
 0x273   :  { %v1727_v51 = vmul.f32 %v3105_v34, %v1575_v42  ;;  %v1567_v53 = vadd.f32 %v3103_v44, %v1566_v11  ;;  %v1756_v2 = vsel %vm1691_vm5, %v1564_v28, %v1724_v40  ;;  %vm1694_vm6 = vcmp.ge.f32.partialorder %v1575_v42, 0.0 }
 0x274   :  { %1824 = vadd.xlane.f32.xlu0 %v1790_v49  ;;  %v2175_v59 = vpop.f32.mrf.mxu0  ;;  %v1788_v4 = vmul.f32 %v1756_v2, %v406_v60 }
 0x275   :  { %vm1692_vm7 = vcmp.ge.f32.partialorder %v1567_v53, 0.0  ;;  %v1725_v45 = vmul.f32 %v3105_v34, %v1567_v53  ;;  %v1588_v46 = vadd.f32 %v2175_v59, %v3103_v44  ;;  %v1759_v5 = vsel %vm1694_vm6, %v1575_v42, %v1727_v51 }
 0x276   :  { %v1579_v61 = vpop.f32.mrf.mxu0  ;;  %v1791_v60 = vmul.f32 %v3071_v0, %v1759_v5 }
 0x277   :  { %vm1697_vm8 = vcmp.ge.f32.partialorder %v1588_v46, 0.0  ;;  %v1730_v3 = vmul.f32 %v3105_v34, %v1588_v46  ;;  %v1580_v56 = vadd.f32 %v3103_v44, %v1579_v61  ;;  %v1757_v6 = vsel %vm1692_vm7, %v1567_v53, %v1725_v45 }
 0x278   :  { %v2176_v15 = vpop.f32.mrf.mxu0  ;;  %1820 = vadd.xlane.f32.xlu0 %v1788_v4  ;;  %v1789_v14 = vmul.f32 %v1757_v6, %v409_v54 }
 0x279   :  { %v1728_v50 = vmul.f32 %v3105_v34, %v1580_v56  ;;  %v1591_v19 = vadd.f32 %v2176_v15, %v3103_v44  ;;  %v1762_v10 = vsel %vm1697_vm8, %v1588_v46, %v1730_v3  ;;  %vm1695_vm9 = vcmp.ge.f32.partialorder %v1580_v56, 0.0 }
 0x27a   :  { %v1582_v20 = vpop.f32.mrf.mxu0  ;;  %1822 = vadd.xlane.f32.xlu1 %v1789_v14  ;;  %v1794_v33 = vmul.f32 %v3078_v18, %v1762_v10 }
 0x27b   :  { %v1731_v21 = vmul.f32 %v3105_v34, %v1591_v19  ;;  %v1583_v22 = vadd.f32 %v3103_v44, %v1582_v20  ;;  %vm1698_vm10 = vcmp.ge.f32.partialorder %v1591_v19, 0.0  ;;  %v1760_v36 = vsel %vm1695_vm9, %v1580_v56, %v1728_v50 }
 0x27c   :  { %1826 = vadd.xlane.f32.xlu0 %v1791_v60  ;;  %v1792_v39 = vmul.f32 %v1760_v36, %v3080_v27 }
 0x27d   :  { %v1729_v54 = vmul.f32 %v3105_v34, %v1583_v22  ;;  %v1763_v1 = vsel %vm1698_vm10, %v1591_v19, %v1731_v21  ;;  %vm1696_vm11 = vcmp.ge.f32.partialorder %v1583_v22, 0.0 }
 0x27e   :  { %1832 = vadd.xlane.f32.xlu1 %v1794_v33  ;;  %v1795_v38 = vmul.f32 %v2080_v12, %v1763_v1 }
 0x27f   :  { %v1761_v28 = vsel %vm1696_vm11, %v1583_v22, %v1729_v54 }
 0x280   :  { %1834 = vadd.xlane.f32.xlu0 %v1795_v38  ;;  %v1793_v0 = vmul.f32 %v1761_v28, %v3082_v23 }
 0x282   :  { %1828 = vadd.xlane.f32.xlu1 %v1792_v39 }
 0x284   :  { %1830 = vadd.xlane.f32.xlu0 %v1793_v0 }
 0x28a   :  { %v2179_v40 = vpop.f32.mrf.mxu0 }
 0x28b   :  { %v1604_v42 = vadd.f32 %v2179_v40, %v3103_v44 }
 0x28c   :  { %v1595_v43 = vpop.f32.mrf.mxu0 }
 0x28d   :  { %vm1701_vm12 = vcmp.ge.f32.partialorder %v1604_v42, 0.0  ;;  %v1734_v18 = vmul.f32 %v3105_v34, %v1604_v42  ;;  %v1596_v11 = vadd.f32 %v3103_v44, %v1595_v43 }
 0x28e   :  { %v2180_v49 = vpop.f32.mrf.mxu0 }
 0x28f   :  { %vm1699_vm13 = vcmp.ge.f32.partialorder %v1596_v11, 0.0  ;;  %v1732_v12 = vmul.f32 %v3105_v34, %v1596_v11  ;;  %v1607_v51 = vadd.f32 %v2180_v49, %v3103_v44  ;;  %v1766_v27 = vsel %vm1701_vm12, %v1604_v42, %v1734_v18 }
 0x290   :  { %v1598_v53 = vpop.f32.mrf.mxu0  ;;  %v1798_v23 = vmul.f32 %v3084_v24, %v1766_v27 }
 0x291   :  { %v1735_v2 = vmul.f32 %v3105_v34, %v1607_v51  ;;  %v1599_v59 = vadd.f32 %v3103_v44, %v1598_v53  ;;  %v1764_v45 = vsel %vm1699_vm13, %v1596_v11, %v1732_v12  ;;  %vm1702_vm14 = vcmp.ge.f32.partialorder %v1607_v51, 0.0 }
 0x292   :  { %1840 = vadd.xlane.f32.xlu1 %v1798_v23  ;;  %v1796_v4 = vmul.f32 %v1764_v45, %v3086_v25 }
 0x293   :  { %v1733_v46 = vmul.f32 %v3105_v34, %v1599_v59  ;;  %v1767_v61 = vsel %vm1702_vm14, %v1607_v51, %v1735_v2  ;;  %vm1700_vm15 = vcmp.ge.f32.partialorder %v1599_v59, 0.0 }
 0x294   :  { %v1799_v5 = vmul.f32 %v3088_v16, %v1767_v61 }
 0x295   :  { %v1765_v3 = vsel %vm1700_vm15, %v1599_v59, %v1733_v46 }
 0x296   :  { %1836 = vadd.xlane.f32.xlu1 %v1796_v4  ;;  %1842 = vadd.xlane.f32.xlu0 %v1799_v5  ;;  %v1797_v24 = vmul.f32 %v1765_v3, %v3090_v26 }
 0x29a   :  { %1838 = vadd.xlane.f32.xlu0 %v1797_v24 }
 0x2a2   :  { %v2183_v56 = vpop.f32.mrf.mxu0 }
 0x2a3   :  { %v1620_v6 = vadd.f32 %v2183_v56, %v3103_v44 }
 0x2a4   :  { %v1611_v15 = vpop.f32.mrf.mxu0 }
 0x2a5   :  { %vm1705_vm0 = vcmp.ge.f32.partialorder %v1620_v6, 0.0  ;;  %v1738_v14 = vmul.f32 %v3105_v34, %v1620_v6  ;;  %v1612_v50 = vadd.f32 %v3103_v44, %v1611_v15 }
 0x2a6   :  { %v2184_v19 = vpop.f32.mrf.mxu0 }
 0x2a7   :  { %vm1703_vm1 = vcmp.ge.f32.partialorder %v1612_v50, 0.0  ;;  %v1736_v25 = vmul.f32 %v3105_v34, %v1612_v50  ;;  %v1623_v16 = vadd.f32 %v2184_v19, %v3103_v44  ;;  %v1770_v10 = vsel %vm1705_vm0, %v1620_v6, %v1738_v14 }
 0x2a8   :  { %v1614_v20 = vpop.f32.mrf.mxu0  ;;  %v1802_v26 = vmul.f32 %v3092_v29, %v1770_v10  ;;  %vm1884_vm0 = vcmask 7168  }
 0x2a9   :  { %v1739_v60 = vmul.f32 %v3105_v34, %v1623_v16  ;;  %v1615_v21 = vadd.f32 %v3103_v44, %v1614_v20  ;;  %v1768_v22 = vsel %vm1703_vm1, %v1612_v50, %v1736_v25  ;;  %vm1706_vm2 = vcmp.ge.f32.partialorder %v1623_v16, 0.0 }
 0x2aa   :  { %1848 = vadd.xlane.f32.xlu1 %v1802_v26  ;;  %v1800_v1 = vmul.f32 %v1768_v22, %v3094_v30 }
 0x2ab   :  { %v1737_v33 = vmul.f32 %v3105_v34, %v1615_v21  ;;  %v1771_v54 = vsel %vm1706_vm2, %v1623_v16, %v1739_v60  ;;  %vm1704_vm3 = vcmp.ge.f32.partialorder %v1615_v21, 0.0 }
 0x2ac   :  { %v1803_v36 = vmul.f32 %v3096_v48, %v1771_v54 }
 0x2ad   :  { %v1769_v38 = vsel %vm1704_vm3, %v1615_v21, %v1737_v33 }
 0x2ae   :  { %1844 = vadd.xlane.f32.xlu1 %v1800_v1  ;;  %1850 = vadd.xlane.f32.xlu0 %v1803_v36  ;;  %v1801_v29 = vmul.f32 %v1769_v38, %v3098_v31 }
 0x2b2   :  { %1846 = vadd.xlane.f32.xlu0 %v1801_v29 }
 0x2ba   :  { %v2187_v28 = vpop.f32.mrf.mxu0 }
 0x2bb   :  { %v1636_v39 = vadd.f32 %v2187_v28, %v3103_v44 }
 0x2bc   :  { %v1627_v0 = vpop.f32.mrf.mxu0 }
 0x2bd   :  { %vm1709_vm4 = vcmp.ge.f32.partialorder %v1636_v39, 0.0  ;;  %v1742_v40 = vmul.f32 %v3105_v34, %v1636_v39  ;;  %v1628_v42 = vadd.f32 %v3103_v44, %v1627_v0 }
 0x2be   :  { %v2188_v43 = vpop.f32.mrf.mxu0 }
 0x2bf   :  { %vm1707_vm5 = vcmp.ge.f32.partialorder %v1628_v42, 0.0  ;;  %v1740_v30 = vmul.f32 %v3105_v34, %v1628_v42  ;;  %v1639_v48 = vadd.f32 %v2188_v43, %v3103_v44  ;;  %v1774_v18 = vsel %vm1709_vm4, %v1636_v39, %v1742_v40 }
 0x2c0   :  { %v1630_v11 = vpop.f32.mrf.mxu0  ;;  %v1806_v31 = vmul.f32 %v2930_v55, %v1774_v18 }
 0x2c1   :  { %vm1710_vm6 = vcmp.ge.f32.partialorder %v1639_v48, 0.0  ;;  %v1743_v49 = vmul.f32 %v3105_v34, %v1639_v48  ;;  %v1631_v12 = vadd.f32 %v3103_v44, %v1630_v11  ;;  %v1772_v51 = vsel %vm1707_vm5, %v1628_v42, %v1740_v30 }
 0x2c2   :  { %1856 = vadd.xlane.f32.xlu1 %v1806_v31  ;;  %v1804_v23 = vmul.f32 %v1772_v51, %v2937_v32 }
 0x2c3   :  { %vm1708_vm7 = vcmp.ge.f32.partialorder %v1631_v12, 0.0  ;;  %v1741_v27 = vmul.f32 %v3105_v34, %v1631_v12  ;;  %v1775_v53 = vsel %vm1710_vm6, %v1639_v48, %v1743_v49 }
 0x2c4   :  { %v1807_v2 = vmul.f32 %v2942_v35, %v1775_v53 }
 0x2c5   :  { %v1773_v59 = vsel %vm1708_vm7, %v1631_v12, %v1741_v27 }
 0x2c6   :  { %1852 = vadd.xlane.f32.xlu1 %v1804_v23  ;;  %1858 = vadd.xlane.f32.xlu0 %v1807_v2  ;;  %v1805_v55 = vmul.f32 %v1773_v59, %v2949_v37 }
 0x2ca   :  { %1854 = vadd.xlane.f32.xlu0 %v1805_v55 }
 0x2d2   :  { %v2191_v45 = vpop.f32.mrf.mxu0 }
 0x2d3   :  { %v1652_v46 = vadd.f32 %v2191_v45, %v3103_v44 }
 0x2d4   :  { %v1643_v61 = vpop.f32.mrf.mxu0 }
 0x2d5   :  { %vm1713_vm8 = vcmp.ge.f32.partialorder %v1652_v46, 0.0  ;;  %v1746_v4 = vmul.f32 %v3105_v34, %v1652_v46  ;;  %v1644_v5 = vadd.f32 %v3103_v44, %v1643_v61 }
 0x2d6   :  { %v2192_v3 = vpop.f32.mrf.mxu0 }
 0x2d7   :  { %vm1711_vm9 = vcmp.ge.f32.partialorder %v1644_v5, 0.0  ;;  %v1744_v32 = vmul.f32 %v3105_v34, %v1644_v5  ;;  %v1655_v35 = vadd.f32 %v2192_v3, %v3103_v44  ;;  %v1778_v24 = vsel %vm1713_vm8, %v1652_v46, %v1746_v4 }
 0x2d8   :  { %v1646_v56 = vpop.f32.mrf.mxu0  ;;  %v1810_v37 = vmul.f32 %v2954_v41, %v1778_v24 }
 0x2d9   :  { %vm1714_vm10 = vcmp.ge.f32.partialorder %v1655_v35, 0.0  ;;  %v1747_v6 = vmul.f32 %v3105_v34, %v1655_v35  ;;  %v1647_v15 = vadd.f32 %v3103_v44, %v1646_v56  ;;  %v1776_v14 = vsel %vm1711_vm9, %v1644_v5, %v1744_v32 }
 0x2da   :  { %1864 = vadd.xlane.f32.xlu1 %v1810_v37  ;;  %v1808_v25 = vmul.f32 %v1776_v14, %v2961_v47 }
 0x2db   :  { %vm1712_vm11 = vcmp.ge.f32.partialorder %v1647_v15, 0.0  ;;  %v1745_v50 = vmul.f32 %v3105_v34, %v1647_v15  ;;  %v1779_v19 = vsel %vm1714_vm10, %v1655_v35, %v1747_v6 }
 0x2dc   :  { %v1811_v16 = vmul.f32 %v2966_v52, %v1779_v19 }
 0x2dd   :  { %v1777_v10 = vsel %vm1712_vm11, %v1647_v15, %v1745_v50 }
 0x2de   :  { %1860 = vadd.xlane.f32.xlu1 %v1808_v25  ;;  %1866 = vadd.xlane.f32.xlu0 %v1811_v16  ;;  %v1809_v41 = vmul.f32 %v1777_v10, %v2973_v57 }
 0x2e2   :  { %1862 = vadd.xlane.f32.xlu0 %v1809_v41 }
 0x2ea   :  { %v2195_v20 = vpop.f32.mrf.mxu0 }
 0x2eb   :  { %v1668_v26 = vadd.f32 %v2195_v20, %v3103_v44 }
 0x2ec   :  { %v1659_v60 = vpop.f32.mrf.mxu0 }
 0x2ed   :  { %vm1717_vm12 = vcmp.ge.f32.partialorder %v1668_v26, 0.0  ;;  %v1750_v21 = vmul.f32 %v3105_v34, %v1668_v26  ;;  %v1660_v22 = vadd.f32 %v3103_v44, %v1659_v60 }
 0x2ee   :  { %v2196_v33 = vpop.f32.mrf.mxu0 }
 0x2ef   :  { %vm1715_vm13 = vcmp.ge.f32.partialorder %v1660_v22, 0.0  ;;  %v1748_v47 = vmul.f32 %v3105_v34, %v1660_v22  ;;  %v1671_v52 = vadd.f32 %v2196_v33, %v3103_v44  ;;  %v1782_v54 = vsel %vm1717_vm12, %v1668_v26, %v1750_v21 }
 0x2f0   :  { %v1662_v1 = vpop.f32.mrf.mxu0  ;;  %v1814_v57 = vmul.f32 %v2978_v62, %v1782_v54 }
 0x2f1   :  { %vm1718_vm14 = vcmp.ge.f32.partialorder %v1671_v52, 0.0  ;;  %v1751_v36 = vmul.f32 %v3105_v34, %v1671_v52  ;;  %v1663_v38 = vadd.f32 %v3103_v44, %v1662_v1  ;;  %v1780_v29 = vsel %vm1715_vm13, %v1660_v22, %v1748_v47 }
 0x2f2   :  { %1872 = vadd.xlane.f32.xlu1 %v1814_v57  ;;  %v1812_v0 = vmul.f32 %v1780_v29, %v2985_v63 }
 0x2f3   :  { %vm1716_vm15 = vcmp.ge.f32.partialorder %v1663_v38, 0.0  ;;  %v1749_v28 = vmul.f32 %v3105_v34, %v1663_v38  ;;  %v1783_v39 = vsel %vm1718_vm14, %v1671_v52, %v1751_v36 }
 0x2f4   :  { %v1815_v40 = vmul.f32 %v2989_v7, %v1783_v39 }
 0x2f5   :  { %v1781_v42 = vsel %vm1716_vm15, %v1663_v38, %v1749_v28 }
 0x2f6   :  { %1868 = vadd.xlane.f32.xlu1 %v1812_v0  ;;  %1874 = vadd.xlane.f32.xlu0 %v1815_v40  ;;  %v1813_v62 = vmul.f32 %v1781_v42, %v2995_v13 }
 0x2fa   :  { %1870 = vadd.xlane.f32.xlu0 %v1813_v62 }
 0x2fd   :  { %v1825_v43 = vpop.xlane.xlu0 %1824 }
 0x2fe   :  { %1887 = vst.msk [vmem:[%s3337_s10 + $0x10] sm:$0xff] %vm1884_vm0, %v1825_v43 }
 0x301   :  { %v1821_v30 = vpop.xlane.xlu0 %1820 }
 0x302   :  { %1885 = vst.msk [vmem:[%s3337_s10] sm:$0xff] %vm1884_vm0, %v1821_v30  ;;  %v2199_v63 = vpop.f32.mrf.mxu0 }
 0x303   :  { %v1684_v7 = vadd.f32 %v2199_v63, %v3103_v44  ;;  %v1823_v48 = vpop.xlane.xlu1 %1822 }
 0x304   :  { %1886 = vst.msk [vmem:[%s3337_s10 + $0x8] sm:$0xff] %vm1884_vm0, %v1823_v48  ;;  %v1675_v13 = vpop.f32.mrf.mxu0 }
 0x305   :  { %v1676_v18 = vadd.f32 %v3103_v44, %v1675_v13  ;;  %v1827_v11 = vpop.xlane.xlu0 %1826  ;;  %v1754_v49 = vmul.f32 %v3105_v34, %v1684_v7  ;;  %vm1721_vm2 = vcmp.ge.f32.partialorder %v1684_v7, 0.0 }
 0x306   :  { %1888 = vst.msk [vmem:[%s3337_s10 + $0x18] sm:$0xff] %vm1884_vm0, %v1827_v11  ;;  %v2200_v31 = vpop.f32.mrf.mxu0 }
 0x307   :  { %vm1719_vm1 = vcmp.ge.f32.partialorder %v1676_v18, 0.0  ;;  %v1752_v12 = vmul.f32 %v3105_v34, %v1676_v18  ;;  %v1687_v51 = vadd.f32 %v2200_v31, %v3103_v44  ;;  %v1833_v27 = vpop.xlane.xlu1 %1832  ;;  %v1786_v4 = vsel %vm1721_vm2, %v1684_v7, %v1754_v49 }
 0x308   :  { %1891 = vst.msk [vmem:[%s3337_s10 + $0x30] sm:$0xff] %vm1884_vm0, %v1833_v27  ;;  %v1678_v53 = vpop.f32.mrf.mxu0 }
 0x309   :  { %v1679_v23 = vadd.f32 %v3103_v44, %v1678_v53  ;;  %v1835_v2 = vpop.xlane.xlu0 %1834  ;;  %v1784_v59 = vsel %vm1719_vm1, %v1676_v18, %v1752_v12  ;;  %v1755_v45 = vmul.f32 %v3105_v34, %v1687_v51  ;;  %vm1722_vm4 = vcmp.ge.f32.partialorder %v1687_v51, 0.0 }
 0x30a   :  { %1892 = vst.msk [vmem:[%s3337_s10 + $0x38] sm:$0xff] %vm1884_vm0, %v1835_v2  ;;  %v1816_v55 = vmul.f32 %v1784_v59, %v2999_v58  ;;  %v1818_v58 = vmul.f32 %v2997_v8, %v1786_v4 }
 0x30b   :  { %vm1720_vm3 = vcmp.ge.f32.partialorder %v1679_v23, 0.0  ;;  %v1753_v46 = vmul.f32 %v3105_v34, %v1679_v23  ;;  %v1829_v61 = vpop.xlane.xlu1 %1828  ;;  %v1787_v3 = vsel %vm1722_vm4, %v1687_v51, %v1755_v45 }
 0x30c   :  { %1889 = vst.msk [vmem:[%s3337_s10 + $0x20] sm:$0xff] %vm1884_vm0, %v1829_v61  ;;  %1876 = vadd.xlane.f32.xlu1 %v1816_v55  ;;  %v1819_v32 = vmul.f32 %v3001_v17, %v1787_v3 }
 0x30d   :  { %v1831_v44 = vpop.xlane.xlu0 %1830  ;;  %v1785_v5 = vsel %vm1720_vm3, %v1679_v23, %v1753_v46 }
 0x30e   :  { %1890 = vst.msk [vmem:[%s3337_s10 + $0x28] sm:$0xff] %vm1884_vm0, %v1831_v44  ;;  %v1817_v34 = vmul.f32 %v1785_v5, %v3003_v9 }
 0x310   :  { %1880 = vadd.xlane.f32.xlu1 %v1818_v58  ;;  %1878 = vadd.xlane.f32.xlu0 %v1817_v34 }
 0x314   :  { %1882 = vadd.xlane.f32.xlu0 %v1819_v32 }
 0x31b   :  { %v1841_v35 = vpop.xlane.xlu1 %1840 }
 0x31c   :  { %1895 = vst.msk [vmem:[%s3337_s10 + $0x50] sm:$0xff] %vm1884_vm0, %v1841_v35 }
 0x31f   :  { %v1837_v24 = vpop.xlane.xlu1 %1836  ;;  %v1843_v56 = vpop.xlane.xlu0 %1842 }
 0x320   :  { %1893 = vst.msk [vmem:[%s3337_s10 + $0x40] sm:$0xff] %vm1884_vm0, %v1837_v24  ;;  %1896 = vst.msk [vmem:[%s3337_s10 + $0x58] sm:$0xff] %vm1884_vm0, %v1843_v56 }
 0x323   :  { %v1839_v8 = vpop.xlane.xlu0 %1838 }
 0x324   :  { %1894 = vst.msk [vmem:[%s3337_s10 + $0x48] sm:$0xff] %vm1884_vm0, %v1839_v8 }
 0x333   :  { %v1849_v17 = vpop.xlane.xlu1 %1848 }
 0x334   :  { %1899 = vst.msk [vmem:[%s3337_s10 + $0x70] sm:$0xff] %vm1884_vm0, %v1849_v17 }
 0x337   :  { %v1845_v9 = vpop.xlane.xlu1 %1844  ;;  %v1851_v37 = vpop.xlane.xlu0 %1850 }
 0x338   :  { %1897 = vst.msk [vmem:[%s3337_s10 + $0x60] sm:$0xff] %vm1884_vm0, %v1845_v9  ;;  %1900 = vst.msk [vmem:[%s3337_s10 + $0x78] sm:$0xff] %vm1884_vm0, %v1851_v37 }
 0x33b   :  { %v1847_v6 = vpop.xlane.xlu0 %1846 }
 0x33c   :  { %1898 = vst.msk [vmem:[%s3337_s10 + $0x68] sm:$0xff] %vm1884_vm0, %v1847_v6 }
 0x34b   :  { %v1857_v15 = vpop.xlane.xlu1 %1856 }
 0x34c   :  { %1903 = vst.msk [vmem:[%s3337_s10 + $0x90] sm:$0xff] %vm1884_vm0, %v1857_v15 }
 0x34f   :  { %v1853_v14 = vpop.xlane.xlu1 %1852  ;;  %v1859_v50 = vpop.xlane.xlu0 %1858 }
 0x350   :  { %1901 = vst.msk [vmem:[%s3337_s10 + $0x80] sm:$0xff] %vm1884_vm0, %v1853_v14  ;;  %1904 = vst.msk [vmem:[%s3337_s10 + $0x98] sm:$0xff] %vm1884_vm0, %v1859_v50 }
 0x353   :  { %v1855_v19 = vpop.xlane.xlu0 %1854 }
 0x354   :  { %1902 = vst.msk [vmem:[%s3337_s10 + $0x88] sm:$0xff] %vm1884_vm0, %v1855_v19 }
 0x363   :  { %v1865_v25 = vpop.xlane.xlu1 %1864 }
 0x364   :  { %1907 = vst.msk [vmem:[%s3337_s10 + $0xb0] sm:$0xff] %vm1884_vm0, %v1865_v25 }
 0x367   :  { %v1861_v16 = vpop.xlane.xlu1 %1860  ;;  %v1867_v10 = vpop.xlane.xlu0 %1866 }
 0x368   :  { %1905 = vst.msk [vmem:[%s3337_s10 + $0xa0] sm:$0xff] %vm1884_vm0, %v1861_v16  ;;  %1908 = vst.msk [vmem:[%s3337_s10 + $0xb8] sm:$0xff] %vm1884_vm0, %v1867_v10 }
 0x36b   :  { %v1863_v41 = vpop.xlane.xlu0 %1862 }
 0x36c   :  { %1906 = vst.msk [vmem:[%s3337_s10 + $0xa8] sm:$0xff] %vm1884_vm0, %v1863_v41 }
 0x37b   :  { %v1873_v20 = vpop.xlane.xlu1 %1872 }
 0x37c   :  { %1911 = vst.msk [vmem:[%s3337_s10 + $0xd0] sm:$0xff] %vm1884_vm0, %v1873_v20 }
 0x37f   :  { %v1869_v26 = vpop.xlane.xlu1 %1868  ;;  %v1875_v60 = vpop.xlane.xlu0 %1874 }
 0x380   :  { %1909 = vst.msk [vmem:[%s3337_s10 + $0xc0] sm:$0xff] %vm1884_vm0, %v1869_v26  ;;  %1912 = vst.msk [vmem:[%s3337_s10 + $0xd8] sm:$0xff] %vm1884_vm0, %v1875_v60 }
 0x383   :  { %v1871_v21 = vpop.xlane.xlu0 %1870 }
 0x384   :  { %1910 = vst.msk [vmem:[%s3337_s10 + $0xc8] sm:$0xff] %vm1884_vm0, %v1871_v21 }
 0x395   :  { %v1877_v22 = vpop.xlane.xlu1 %1876 }
 0x396   :  { %1913 = vst.msk [vmem:[%s3337_s10 + $0xe0] sm:$0xff] %vm1884_vm0, %v1877_v22 }
 0x399   :  { %v1881_v33 = vpop.xlane.xlu1 %1880  ;;  %v1879_v47 = vpop.xlane.xlu0 %1878 }
 0x39a   :  { %1915 = vst.msk [vmem:[%s3337_s10 + $0xf0] sm:$0xff] %vm1884_vm0, %v1881_v33  ;;  %1914 = vst.msk [vmem:[%s3337_s10 + $0xe8] sm:$0xff] %vm1884_vm0, %v1879_v47 }
 0x39d   :  { %v1883_v52 = vpop.xlane.xlu0 %1882 }
 0x39e   :  { %1916 = vst.msk [vmem:[%s3337_s10 + $0xf8] sm:$0xff] %vm1884_vm0, %v1883_v52 }
 0x39f   :  { %1921 = vsyncpa [#allocation3], 1 }

</bundles_post_ra>
